<compile_context>
chip_gen: v7x
topology: tpu7x:2x2x1
jax: 0.10.0
libtpu: 0.0.40
codegen_flags: <defaults>
</compile_context>

<pallas_src>
import functools

import jax
import jax.numpy as jnp
import numpy as np
from jax import lax
from jax.experimental import pallas as pl
from jax.experimental.pallas import tpu as pltpu

EPS = 1e-5          # PyTorch nn.LayerNorm default
NEG_INF = -1e30     # mask value for padded keys
_VMEM_LIMIT = 48 * 1024 * 1024          # <= v7x 64 MiB physical VMEM
_WEIGHT_TILE_BUDGET = 8 * 1024 * 1024   # resident bf16 weight tile budget


def _ln_math(x, g, b):
    mean = jnp.mean(x, axis=-1, keepdims=True)
    var = jnp.mean((x - mean) ** 2, axis=-1, keepdims=True)
    return (x - mean) * lax.rsqrt(var + EPS) * g + b


def _pick(dim, prefs):
    """Largest preferred tile that divides `dim`; otherwise the full dim."""
    for p in prefs:
        if dim >= p and dim % p == 0:
            return p
    return dim


def _pick_tn(N, K):
    """Full N if the bf16 weight tile fits the VMEM budget, else halve until it does."""
    if K * N * 2 <= _WEIGHT_TILE_BUDGET:
        return N
    tn = N
    while tn % 2 == 0 and tn > 128 and K * tn * 2 > _WEIGHT_TILE_BUDGET:
        tn //= 2
    return tn


# ---------------------------------------------------------------------------
# Weight-resident matmul kernel: optional fused LayerNorm prologue on the x tile,
# bf16 MXU matmul with f32 accumulation, fused bias, optional QuickGELU, optional
# residual add (residual aliased to the output).
# ---------------------------------------------------------------------------
def _mm_kernel(*refs, has_ln, has_res, act):
    i = 0
    x_ref = refs[i]; i += 1
    if has_ln:
        g_ref, bln_ref = refs[i], refs[i + 1]; i += 2
    w_ref, b_ref = refs[i], refs[i + 1]; i += 2
    if has_res:
        res_ref = refs[i]; i += 1
    o_ref = refs[i]

    x = x_ref[...]
    if has_ln:
        x = _ln_math(x.astype(jnp.float32), g_ref[...], bln_ref[...])
    y = jnp.dot(x.astype(jnp.bfloat16), w_ref[...].astype(jnp.bfloat16),
                preferred_element_type=jnp.float32) + b_ref[...]
    if act == "quick_gelu":
        y = y * jax.nn.sigmoid(1.702 * y)
    if has_res:
        y = y + res_ref[...]
    o_ref[...] = y.astype(o_ref.dtype)


def _matmul(x, w, b, *, ln=None, residual=None, act=None, out_dtype=jnp.bfloat16):
    M, K = x.shape
    N = w.shape[1]
    tm = _pick(M, (256, 128, 64, 32, 16, 8))   # capped at 256 for v7x VMEM headroom
    tn = _pick_tn(N, K)
    grid = (M // tm, N // tn)

    in_specs = [pl.BlockSpec((tm, K), lambda i, j: (i, 0))]
    inputs = [x]
    if ln is not None:
        g, bln = ln
        in_specs += [pl.BlockSpec((1, K), lambda i, j: (0, 0)),
                     pl.BlockSpec((1, K), lambda i, j: (0, 0))]
        inputs += [g, bln]
    in_specs += [pl.BlockSpec((K, tn), lambda i, j: (0, j)),
                 pl.BlockSpec((1, tn), lambda i, j: (0, j))]
    inputs += [w, b]

    io_alias = {}
    if residual is not None:
        in_specs.append(pl.BlockSpec((tm, tn), lambda i, j: (i, j)))
        inputs.append(residual)
        io_alias = {len(inputs) - 1: 0}   # residual stream updated in place (P8)
        out_dtype = residual.dtype

    kernel = functools.partial(_mm_kernel, has_ln=ln is not None,
                               has_res=residual is not None, act=act)
    return pl.pallas_call(
        kernel,
        out_shape=jax.ShapeDtypeStruct((M, N), out_dtype),
        grid=grid,
        in_specs=in_specs,
        out_specs=pl.BlockSpec((tm, tn), lambda i, j: (i, j)),
        input_output_aliases=io_alias,
        compiler_params=pltpu.CompilerParams(
            dimension_semantics=("parallel", "parallel"),
            vmem_limit_bytes=_VMEM_LIMIT),
    )(*inputs)


# ---------------------------------------------------------------------------
# ln_pre: x + positional_embedding, then LayerNorm (grid over batch).
# Output stays f32: it becomes the residual stream.
# ---------------------------------------------------------------------------
def _pre_kernel(x_ref, pos_ref, g_ref, b_ref, o_ref):
    x = x_ref[0] + pos_ref[...]
    o_ref[0] = _ln_math(x, g_ref[...], b_ref[...]).astype(o_ref.dtype)


def _pre_ln(x0, pos, g, b):
    B, S, W = x0.shape
    return pl.pallas_call(
        _pre_kernel,
        out_shape=jax.ShapeDtypeStruct((B, S, W), jnp.float32),
        grid=(B,),
        in_specs=[pl.BlockSpec((1, S, W), lambda i: (i, 0, 0)),
                  pl.BlockSpec((S, W), lambda i: (0, 0)),
                  pl.BlockSpec((1, W), lambda i: (0, 0)),
                  pl.BlockSpec((1, W), lambda i: (0, 0))],
        out_specs=pl.BlockSpec((1, S, W), lambda i: (i, 0, 0)),
        compiler_params=pltpu.CompilerParams(dimension_semantics=("parallel",)),
    )(x0, pos, g, b)


# ---------------------------------------------------------------------------
# Multi-head self attention, head-packed and lane-dense:
#   * grid = (batch, head_group); each step processes `hp` heads (hp*head_dim = 128 lanes).
#   * q/k/v read directly from the (B, S, 3W) qkv tensor via column-offset index_maps.
#   * output written directly into a (B, S, W) bf16 buffer (full-width stores).
#   * 1/sqrt(head_dim) scale is folded into the q projection weights; padded keys masked.
# ---------------------------------------------------------------------------
def _attn_kernel(q_ref, k_ref, v_ref, o_ref, *, heads, head_dim, seq_valid):
    qall = q_ref[0].astype(jnp.bfloat16)   # (S, heads*head_dim)
    kall = k_ref[0].astype(jnp.bfloat16)
    vall = v_ref[0].astype(jnp.bfloat16)
    S = qall.shape[0]
    need_mask = seq_valid < S
    if need_mask:
        kid = lax.broadcasted_iota(jnp.int32, (1, S), 1)

    outs = []
    for h in range(heads):
        lo = h * head_dim
        q = qall[:, lo:lo + head_dim]
        k = kall[:, lo:lo + head_dim]
        v = vall[:, lo:lo + head_dim]
        s = lax.dot_general(q, k, (((1,), (1,)), ((), ())),
                            preferred_element_type=jnp.float32)          # (S, S)
        if need_mask:
            s = jnp.where(kid < seq_valid, s, NEG_INF)
        s = s - jnp.max(s, axis=-1, keepdims=True)
        p = jnp.exp(s)
        p = p * pl.reciprocal(jnp.sum(p, axis=-1, keepdims=True), approx=True)
        outs.append(lax.dot_general(p.astype(jnp.bfloat16), v, (((1,), (0,)), ((), ())),
                                    preferred_element_type=jnp.float32))  # (S, d)
    o_ref[0] = jnp.concatenate(outs, axis=-1).astype(o_ref.dtype)         # full-width store


def _attention(qkv3, num_heads, head_dim, seq_valid):
    B, S, threeW = qkv3.shape
    width = threeW // 3

    # heads per grid step: aim for 128-lane (full vreg-width) blocks.
    hp = max(1, 128 // head_dim) if head_dim < 128 else 1
    hp = min(hp, num_heads)
    while num_heads % hp != 0:
        hp -= 1
    bd = hp * head_dim
    if bd % 128 != 0:
        hp, bd = num_heads, width   # fall back to all heads per step (width % 128 == 0)

    nb = width // bd                 # head-group blocks per q/k/v section
    q_spec = pl.BlockSpec((1, S, bd), lambda b, g: (b, 0, g))
    k_spec = pl.BlockSpec((1, S, bd), lambda b, g: (b, 0, nb + g))
    v_spec = pl.BlockSpec((1, S, bd), lambda b, g: (b, 0, 2 * nb + g))
    out_spec = pl.BlockSpec((1, S, bd), lambda b, g: (b, 0, g))

    kernel = functools.partial(_attn_kernel, heads=hp, head_dim=head_dim,
                               seq_valid=seq_valid)
    return pl.pallas_call(
        kernel,
        out_shape=jax.ShapeDtypeStruct((B, S, width), jnp.bfloat16),
        grid=(B, num_heads // hp),
        in_specs=[q_spec, k_spec, v_spec],
        out_specs=out_spec,
        compiler_params=pltpu.CompilerParams(
            dimension_semantics=("parallel", "parallel"),
            vmem_limit_bytes=_VMEM_LIMIT),
    )(qkv3, qkv3, qkv3)


# ---------------------------------------------------------------------------
# Head: ln_post on CLS token, @ proj, L2-normalize (dim=1).
# ---------------------------------------------------------------------------
def _head_kernel(x_ref, g_ref, b_ref, p_ref, o_ref):
    h = _ln_math(x_ref[...], g_ref[...], b_ref[...])
    y = jnp.dot(h.astype(jnp.bfloat16), p_ref[...].astype(jnp.bfloat16),
                preferred_element_type=jnp.float32)
    inv = lax.rsqrt(jnp.sum(y * y, axis=-1, keepdims=True))
    o_ref[...] = y * inv   # no epsilon: matches image_features / norm(dim=1)


def _head(x_cls, g, b, proj):
    Bn, W = x_cls.shape
    E = proj.shape[1]
    return pl.pallas_call(
        _head_kernel,
        out_shape=jax.ShapeDtypeStruct((Bn, E), jnp.float32),
        grid=(1,),
        in_specs=[pl.BlockSpec((Bn, W), lambda i: (0, 0)),
                  pl.BlockSpec((1, W), lambda i: (0, 0)),
                  pl.BlockSpec((1, W), lambda i: (0, 0)),
                  pl.BlockSpec((W, E), lambda i: (0, 0))],
        out_specs=pl.BlockSpec((Bn, E), lambda i: (0, 0)),
        compiler_params=pltpu.CompilerParams(dimension_semantics=("arbitrary",)),
    )(x_cls, g, b, proj)


# ---------------------------------------------------------------------------
# Parameters (synthetic, deterministic). Linear weights are pre-transposed to
# [in, out] and stored in bf16; the attention scale is folded into wqkv/bqkv.
# ---------------------------------------------------------------------------
def init_params(key, *, width, layers, patch_size, grid, embed_dim, heads):
    seq = grid * grid + 1
    head_dim = width // heads
    scale = head_dim ** -0.5
    keys = iter(jax.random.split(key, 8 + 16 * layers))

    def nrm(shape, s=0.02):
        return s * jax.random.normal(next(keys), shape, dtype=jnp.float32)

    conv_w = nrm((width, 3, patch_size, patch_size))     # visual.conv1.weight
    params = {
        "conv_w": conv_w.reshape(width, -1).T.astype(jnp.bfloat16),   # [3*P*P, W]
        "class_emb": nrm((width,)),                                    # class_embedding
        "pos_emb": nrm((seq, width)),                                  # positional_embedding
        "ln_pre_g": jnp.ones((1, width), jnp.float32) + nrm((1, width)),
        "ln_pre_b": nrm((1, width)),
        "ln_post_g": jnp.ones((1, width), jnp.float32) + nrm((1, width)),
        "ln_post_b": nrm((1, width)),
        "proj": nrm((width, embed_dim)).astype(jnp.bfloat16),          # visual.proj
        "blocks": [],
    }
    for _ in range(layers):
        wq, wk, wv = nrm((width, width)), nrm((width, width)), nrm((width, width))
        bq, bk, bv = nrm((1, width)), nrm((1, width)), nrm((1, width))
        params["blocks"].append({
            "ln1_g": jnp.ones((1, width), jnp.float32) + nrm((1, width)),
            "ln1_b": nrm((1, width)),
            # fused in_proj with the 1/sqrt(head_dim) scale folded into the q columns
            "wqkv": jnp.concatenate([wq * scale, wk, wv], axis=1).astype(jnp.bfloat16),
            "bqkv": jnp.concatenate([bq * scale, bk, bv], axis=1),
            "wo": nrm((width, width)).astype(jnp.bfloat16), "bo": nrm((1, width)),
            "ln2_g": jnp.ones((1, width), jnp.float32) + nrm((1, width)),
            "ln2_b": nrm((1, width)),
            "wfc": nrm((width, 4 * width)).astype(jnp.bfloat16), "bfc": nrm((1, 4 * width)),
            "wcp": nrm((4 * width, width)).astype(jnp.bfloat16), "bcp": nrm((1, width)),
        })
    return params


# ---------------------------------------------------------------------------
# Forward pass (VisualEncoder.forward semantics)
# ---------------------------------------------------------------------------
@functools.partial(jax.jit, static_argnames=("patch_size", "num_heads"))
def visual_encoder_forward(image, params, *, patch_size, num_heads):
    B, C, H, _ = image.shape
    grid = H // patch_size
    G2 = grid * grid
    width = params["conv_w"].shape[-1]
    head_dim = width // num_heads
    seq = G2 + 1
    s_pad = ((seq + 7) // 8) * 8   # sublane-aligned seq; padded keys masked in attention

    # glue: im2col of non-overlapping patches (stride==kernel conv == matmul)
    p = image.reshape(B, C, grid, patch_size, grid, patch_size)
    p = p.transpose(0, 2, 4, 1, 3, 5).reshape(B * G2, C * patch_size * patch_size)

    zero_bias = jnp.zeros((1, width), jnp.float32)
    xp = _matmul(p, params["conv_w"], zero_bias, out_dtype=jnp.float32)   # [B*G2, W]

    # glue (layout only): CLS at row 0, patches at rows 1..G2, zero padding after
    x0 = jnp.zeros((B, s_pad, width), jnp.float32)
    x0 = x0.at[:, 1:seq, :].set(xp.reshape(B, G2, width))
    x0 = x0.at[:, 0, :].set(params["class_emb"][None, :])
    pos = jnp.zeros((s_pad, width), jnp.float32).at[:seq].set(params["pos_emb"])

    x = _pre_ln(x0, pos, params["ln_pre_g"], params["ln_pre_b"])   # [B, s_pad, W] f32
    xf = x.reshape(B * s_pad, width)                               # residual stream (f32)

    for blk in params["blocks"]:
        # --- attention: LN1 fused into the qkv matmul prologue ---
        qkv = _matmul(xf, blk["wqkv"], blk["bqkv"],
                      ln=(blk["ln1_g"], blk["ln1_b"]))              # [B*s_pad, 3W] bf16
        attn = _attention(qkv.reshape(B, s_pad, 3 * width),
                          num_heads, head_dim, seq)                 # [B, s_pad, W] bf16
        xf = _matmul(attn.reshape(B * s_pad, width), blk["wo"], blk["bo"],
                     residual=xf)                                   # fused residual, aliased

        # --- MLP: LN2 fused into the fc matmul prologue, QuickGELU fused in epilogue ---
        f = _matmul(xf, blk["wfc"], blk["bfc"],
                    ln=(blk["ln2_g"], blk["ln2_b"]), act="quick_gelu")  # [B*s_pad, 4W] bf16
        xf = _matmul(f, blk["wcp"], blk["bcp"], residual=xf)        # fused residual, aliased

    cls_out = xf.reshape(B, s_pad, width)[:, 0, :]                  # glue slice of CLS token
    return _head(cls_out, params["ln_post_g"], params["ln_post_b"], params["proj"])


# ---------------------------------------------------------------------------
# pure-JAX reference (same math, mirrored bf16 matmul inputs, unpadded seq)
# ---------------------------------------------------------------------------
def _mm_ref(x, w):
    return jnp.dot(x.astype(jnp.bfloat16), w.astype(jnp.bfloat16),
                   preferred_element_type=jnp.float32)


def reference_forward(image, params, *, patch_size, num_heads):
    B, C, H, _ = image.shape
    g = H // patch_size
    G2 = g * g
    W = params["class_emb"].shape[0]
    d = W // num_heads
    S = G2 + 1

    p = image.reshape(B, C, g, patch_size, g, patch_size)
    p = p.transpose(0, 2, 4, 1, 3, 5).reshape(B * G2, C * patch_size * patch_size)
    xp = _mm_ref(p, params["conv_w"]).reshape(B, G2, W)
    cls = jnp.broadcast_to(params["class_emb"][None, None, :], (B, 1, W))
    x = jnp.concatenate([cls, xp], axis=1) + params["pos_emb"][None]
    x = _ln_math(x, params["ln_pre_g"], params["ln_pre_b"])
    for blk in params["blocks"]:
        h = _ln_math(x, blk["ln1_g"], blk["ln1_b"])
        qkv = (_mm_ref(h.reshape(B * S, W), blk["wqkv"]) + blk["bqkv"]).reshape(B, S, 3 * W)
        qkv = qkv.astype(jnp.bfloat16).astype(jnp.float32)   # mirror bf16 storage of qkv
        q = qkv[..., :W].reshape(B, S, num_heads, d)
        k = qkv[..., W:2 * W].reshape(B, S, num_heads, d)
        v = qkv[..., 2 * W:].reshape(B, S, num_heads, d)
        s = jnp.einsum("bqhd,bkhd->bhqk", q.astype(jnp.bfloat16), k.astype(jnp.bfloat16),
                       preferred_element_type=jnp.float32)
        s = s - s.max(-1, keepdims=True)
        pa = jnp.exp(s)
        pa = pa / pa.sum(-1, keepdims=True)
        a = jnp.einsum("bhqk,bkhd->bqhd", pa.astype(jnp.bfloat16), v.astype(jnp.bfloat16),
                       preferred_element_type=jnp.float32).reshape(B, S, W)
        x = x + (_mm_ref(a.reshape(B * S, W), blk["wo"]) + blk["bo"]).reshape(B, S, W)
        h = _ln_math(x, blk["ln2_g"], blk["ln2_b"])
        f = _mm_ref(h.reshape(B * S, W), blk["wfc"]) + blk["bfc"]
        f = f * jax.nn.sigmoid(1.702 * f)
        x = x + (_mm_ref(f, blk["wcp"]) + blk["bcp"]).reshape(B, S, W)
    y = _mm_ref(_ln_math(x[:, 0, :], params["ln_post_g"], params["ln_post_b"]), params["proj"])
    return y / jnp.linalg.norm(y, axis=1, keepdims=True)


if __name__ == "__main__":
    # small CLIP-like config: 16x16 image, 8x8 patches -> 2x2 grid, seq=5 (padded to 8)
    # width=128 -> heads = width // 64 = 2, so the multi-head / head-packed path is exercised.
    B, C, RES, PATCH = 2, 3, 16, 8
    WIDTH, LAYERS, EMBED = 128, 2, 128
    HEADS = WIDTH // 64
    GRID = RES // PATCH

    key = jax.random.PRNGKey(0)
    kp, kx = jax.random.split(key)
    params = init_params(kp, width=WIDTH, layers=LAYERS, patch_size=PATCH,
                         grid=GRID, embed_dim=EMBED, heads=HEADS)
    image = jax.random.normal(kx, (B, C, RES, RES), dtype=jnp.float32)

    out = visual_encoder_forward(image, params, patch_size=PATCH, num_heads=HEADS)
    out = jax.block_until_ready(out)

    ref = reference_forward(image, params, patch_size=PATCH, num_heads=HEADS)
    assert out.shape == (B, EMBED)
    err = np.max(np.abs(np.asarray(out) - np.asarray(ref)))
    assert np.allclose(np.asarray(out), np.asarray(ref), atol=1e-2, rtol=1e-2), err
    # forward() L2-normalizes along dim=1
    assert np.allclose(np.linalg.norm(np.asarray(out), axis=1), 1.0, atol=1e-4)

    print("KERNEL_OK")
</pallas_src>

<mosaic_0001>
module attributes {stable_mosaic.version = 11 : i64} {
  func.func @_mm_kernel(%arg0: i32, %arg1: i32, %arg2: memref<8x192xf32, #tpu.memory_space<vmem>>, %arg3: memref<192x128xbf16, #tpu.memory_space<vmem>>, %arg4: memref<1x128xf32, #tpu.memory_space<vmem>>, %arg5: memref<8x128xf32, #tpu.memory_space<vmem>>) attributes {dimension_semantics = [#tpu.dimension_semantics<parallel>, #tpu.dimension_semantics<parallel>], iteration_bounds = array<i64: 1, 1>, scalar_prefetch = 0 : i64, scratch_operands = 0 : i64, tpu.core_type = #tpu.core_type<tc>, window_params = [{transform_indices = @transform_0, window_bounds = array<i64: 8, 192>}, {transform_indices = @transform_1, window_bounds = array<i64: 192, 128>}, {transform_indices = @transform_2, window_bounds = array<i64: 1, 128>}, {transform_indices = @transform_3, window_bounds = array<i64: 8, 128>}]} {
    %c0 = arith.constant 0 : index
    %c0_0 = arith.constant 0 : index
    %0 = vector.load %arg2[%c0, %c0_0] : memref<8x192xf32, #tpu.memory_space<vmem>>, vector<8x192xf32>
    %1 = arith.truncf %0 : vector<8x192xf32> to vector<8x192xbf16>
    %c0_1 = arith.constant 0 : index
    %c0_2 = arith.constant 0 : index
    %2 = vector.load %arg3[%c0_1, %c0_2] : memref<192x128xbf16, #tpu.memory_space<vmem>>, vector<192x128xbf16>
    %cst = arith.constant dense<0.000000e+00> : vector<8x128xf32>
    %3 = tpu.matmul %1, %2, %cst {dimension_numbers = #tpu.dot_dimension_numbers<[1], [0], [0], [1], [0, 0, 1, 1], [], []>} : vector<8x192xbf16>, vector<192x128xbf16>, vector<8x128xf32> -> vector<8x128xf32>
    %c0_3 = arith.constant 0 : index
    %c0_4 = arith.constant 0 : index
    %4 = vector.load %arg4[%c0_3, %c0_4] : memref<1x128xf32, #tpu.memory_space<vmem>>, vector<1x128xf32>
    %5 = vector.broadcast %4 : vector<1x128xf32> to vector<8x128xf32>
    %6 = arith.addf %3, %5 : vector<8x128xf32>
    %c0_5 = arith.constant 0 : index
    %c0_6 = arith.constant 0 : index
    %7 = vector.load %arg5[%c0_5, %c0_6] : memref<8x128xf32, #tpu.memory_space<vmem>>, vector<8x128xf32>
    tpu.vector_store %arg5[%c0_5, %c0_6], %6 {strides = array<i32>} : memref<8x128xf32, #tpu.memory_space<vmem>>, vector<8x128xf32>,
    return
  }
  func.func @transform_0(%arg0: i32, %arg1: i32) -> (i32, i32) {
    %c0_i32 = arith.constant 0 : i32
    %c0_i32_0 = arith.constant 0 : i32
    return %arg0, %c0_i32 : i32, i32
  }
  func.func @transform_1(%arg0: i32, %arg1: i32) -> (i32, i32) {
    %c0_i32 = arith.constant 0 : i32
    %c0_i32_0 = arith.constant 0 : i32
    return %c0_i32, %arg1 : i32, i32
  }
  func.func @transform_2(%arg0: i32, %arg1: i32) -> (i32, i32) {
    %c0_i32 = arith.constant 0 : i32
    %c0_i32_0 = arith.constant 0 : i32
    return %c0_i32, %arg1 : i32, i32
  }
  func.func @transform_3(%arg0: i32, %arg1: i32) -> (i32, i32) {
    %c0_i32 = arith.constant 0 : i32
    return %arg0, %arg1 : i32, i32
  }
}

module attributes {stable_mosaic.version = 11 : i64} {
  func.func @_mm_kernel(%arg0: i32, %arg1: i32, %arg2: memref<16x128xf32, #tpu.memory_space<vmem>>, %arg3: memref<1x128xf32, #tpu.memory_space<vmem>>, %arg4: memref<1x128xf32, #tpu.memory_space<vmem>>, %arg5: memref<128x384xbf16, #tpu.memory_space<vmem>>, %arg6: memref<1x384xf32, #tpu.memory_space<vmem>>, %arg7: memref<16x384xbf16, #tpu.memory_space<vmem>>) attributes {dimension_semantics = [#tpu.dimension_semantics<parallel>, #tpu.dimension_semantics<parallel>], iteration_bounds = array<i64: 1, 1>, scalar_prefetch = 0 : i64, scratch_operands = 0 : i64, tpu.core_type = #tpu.core_type<tc>, window_params = [{transform_indices = @transform_0, window_bounds = array<i64: 16, 128>}, {pipeline_mode = #tpu.pipeline_mode<synchronous>, transform_indices = @transform_1, window_bounds = array<i64: 1, 128>}, {pipeline_mode = #tpu.pipeline_mode<synchronous>, transform_indices = @transform_2, window_bounds = array<i64: 1, 128>}, {transform_indices = @transform_3, window_bounds = array<i64: 128, 384>}, {transform_indices = @transform_4, window_bounds = array<i64: 1, 384>}, {transform_indices = @transform_5, window_bounds = array<i64: 16, 384>}]} {
    %c0 = arith.constant 0 : index
    %c0_0 = arith.constant 0 : index
    %0 = vector.load %arg2[%c0, %c0_0] : memref<16x128xf32, #tpu.memory_space<vmem>>, vector<16x128xf32>
    %c0_1 = arith.constant 0 : index
    %c0_2 = arith.constant 0 : index
    %1 = vector.load %arg3[%c0_1, %c0_2] : memref<1x128xf32, #tpu.memory_space<vmem>>, vector<1x128xf32>
    %c0_3 = arith.constant 0 : index
    %c0_4 = arith.constant 0 : index
    %2 = vector.load %arg4[%c0_3, %c0_4] : memref<1x128xf32, #tpu.memory_space<vmem>>, vector<1x128xf32>
    %cst = arith.constant dense<0.000000e+00> : vector<16xf32>
    %3 = vector.multi_reduction <add>, %0, %cst [1] : vector<16x128xf32> to vector<16xf32>
    %4 = vector.shape_cast %3 : vector<16xf32> to vector<16x1xf32>
    %cst_5 = arith.constant 1.280000e+02 : f32
    %5 = vector.broadcast %cst_5 : f32 to vector<16x1xf32>
    %6 = arith.divf %4, %5 : vector<16x1xf32>
    %7 = vector.broadcast %6 : vector<16x1xf32> to vector<16x128xf32>
    %8 = arith.subf %0, %7 : vector<16x128xf32>
    %9 = arith.mulf %8, %8 : vector<16x128xf32>
    %cst_6 = arith.constant dense<0.000000e+00> : vector<16xf32>
    %10 = vector.multi_reduction <add>, %9, %cst_6 [1] : vector<16x128xf32> to vector<16xf32>
    %11 = vector.shape_cast %10 : vector<16xf32> to vector<16x1xf32>
    %cst_7 = arith.constant 1.280000e+02 : f32
    %12 = vector.broadcast %cst_7 : f32 to vector<16x1xf32>
    %13 = arith.divf %11, %12 : vector<16x1xf32>
    %14 = vector.broadcast %6 : vector<16x1xf32> to vector<16x128xf32>
    %15 = arith.subf %0, %14 : vector<16x128xf32>
    %cst_8 = arith.constant 9.99999974E-6 : f32
    %16 = vector.broadcast %cst_8 : f32 to vector<16x1xf32>
    %17 = arith.addf %13, %16 : vector<16x1xf32>
    %18 = math.rsqrt %17 : vector<16x1xf32>
    %19 = vector.broadcast %18 : vector<16x1xf32> to vector<16x128xf32>
    %20 = arith.mulf %15, %19 : vector<16x128xf32>
    %21 = vector.broadcast %1 : vector<1x128xf32> to vector<16x128xf32>
    %22 = arith.mulf %20, %21 : vector<16x128xf32>
    %23 = vector.broadcast %2 : vector<1x128xf32> to vector<16x128xf32>
    %24 = arith.addf %22, %23 : vector<16x128xf32>
    %25 = arith.truncf %24 : vector<16x128xf32> to vector<16x128xbf16>
    %c0_9 = arith.constant 0 : index
    %c0_10 = arith.constant 0 : index
    %26 = vector.load %arg5[%c0_9, %c0_10] : memref<128x384xbf16, #tpu.memory_space<vmem>>, vector<128x384xbf16>
    %cst_11 = arith.constant dense<0.000000e+00> : vector<16x384xf32>
    %27 = tpu.matmul %25, %26, %cst_11 {dimension_numbers = #tpu.dot_dimension_numbers<[1], [0], [0], [1], [0, 0, 1, 1], [], []>} : vector<16x128xbf16>, vector<128x384xbf16>, vector<16x384xf32> -> vector<16x384xf32>
    %c0_12 = arith.constant 0 : index
    %c0_13 = arith.constant 0 : index
    %28 = vector.load %arg6[%c0_12, %c0_13] : memref<1x384xf32, #tpu.memory_space<vmem>>, vector<1x384xf32>
    %29 = vector.broadcast %28 : vector<1x384xf32> to vector<16x384xf32>
    %30 = arith.addf %27, %29 : vector<16x384xf32>
    %31 = arith.truncf %30 : vector<16x384xf32> to vector<16x384xbf16>
    %c0_14 = arith.constant 0 : index
    %c0_15 = arith.constant 0 : index
    %32 = vector.load %arg7[%c0_14, %c0_15] : memref<16x384xbf16, #tpu.memory_space<vmem>>, vector<16x384xbf16>
    tpu.vector_store %arg7[%c0_14, %c0_15], %31 {strides = array<i32>} : memref<16x384xbf16, #tpu.memory_space<vmem>>, vector<16x384xbf16>,
    return
  }
  func.func @transform_0(%arg0: i32, %arg1: i32) -> (i32, i32) {
    %c0_i32 = arith.constant 0 : i32
    %c0_i32_0 = arith.constant 0 : i32
    return %arg0, %c0_i32 : i32, i32
  }
  func.func @transform_1(%arg0: i32, %arg1: i32) -> (i32, i32) {
    %c0_i32 = arith.constant 0 : i32
    %c0_i32_0 = arith.constant 0 : i32
    %c0_i32_1 = arith.constant 0 : i32
    return %c0_i32, %c0_i32_0 : i32, i32
  }
  func.func @transform_2(%arg0: i32, %arg1: i32) -> (i32, i32) {
    %c0_i32 = arith.constant 0 : i32
    %c0_i32_0 = arith.constant 0 : i32
    %c0_i32_1 = arith.constant 0 : i32
    return %c0_i32, %c0_i32_0 : i32, i32
  }
  func.func @transform_3(%arg0: i32, %arg1: i32) -> (i32, i32) {
    %c0_i32 = arith.constant 0 : i32
    %c0_i32_0 = arith.constant 0 : i32
    return %c0_i32, %arg1 : i32, i32
  }
  func.func @transform_4(%arg0: i32, %arg1: i32) -> (i32, i32) {
    %c0_i32 = arith.constant 0 : i32
    %c0_i32_0 = arith.constant 0 : i32
    return %c0_i32, %arg1 : i32, i32
  }
  func.func @transform_5(%arg0: i32, %arg1: i32) -> (i32, i32) {
    %c0_i32 = arith.constant 0 : i32
    return %arg0, %arg1 : i32, i32
  }
}

module attributes {stable_mosaic.version = 11 : i64} {
  func.func @_pre_kernel(%arg0: i32, %arg1: memref<1x8x128xf32, #tpu.memory_space<vmem>>, %arg2: memref<8x128xf32, #tpu.memory_space<vmem>>, %arg3: memref<1x128xf32, #tpu.memory_space<vmem>>, %arg4: memref<1x128xf32, #tpu.memory_space<vmem>>, %arg5: memref<1x8x128xf32, #tpu.memory_space<vmem>>) attributes {dimension_semantics = [#tpu.dimension_semantics<parallel>], iteration_bounds = array<i64: 2>, scalar_prefetch = 0 : i64, scratch_operands = 0 : i64, tpu.core_type = #tpu.core_type<tc>, window_params = [{transform_indices = @transform_0, window_bounds = array<i64: 1, 8, 128>}, {pipeline_mode = #tpu.pipeline_mode<synchronous>, transform_indices = @transform_1, window_bounds = array<i64: 8, 128>}, {pipeline_mode = #tpu.pipeline_mode<synchronous>, transform_indices = @transform_2, window_bounds = array<i64: 1, 128>}, {pipeline_mode = #tpu.pipeline_mode<synchronous>, transform_indices = @transform_3, window_bounds = array<i64: 1, 128>}, {transform_indices = @transform_4, window_bounds = array<i64: 1, 8, 128>}]} {
    %c0 = arith.constant 0 : index
    %c0_0 = arith.constant 0 : index
    %c0_1 = arith.constant 0 : index
    %0 = vector.load %arg1[%c0, %c0_0, %c0_1] : memref<1x8x128xf32, #tpu.memory_space<vmem>>, vector<1x8x128xf32>
    %1 = vector.shape_cast %0 : vector<1x8x128xf32> to vector<8x128xf32>
    %c0_2 = arith.constant 0 : index
    %c0_3 = arith.constant 0 : index
    %2 = vector.load %arg2[%c0_2, %c0_3] : memref<8x128xf32, #tpu.memory_space<vmem>>, vector<8x128xf32>
    %3 = arith.addf %1, %2 : vector<8x128xf32>
    %c0_4 = arith.constant 0 : index
    %c0_5 = arith.constant 0 : index
    %4 = vector.load %arg3[%c0_4, %c0_5] : memref<1x128xf32, #tpu.memory_space<vmem>>, vector<1x128xf32>
    %c0_6 = arith.constant 0 : index
    %c0_7 = arith.constant 0 : index
    %5 = vector.load %arg4[%c0_6, %c0_7] : memref<1x128xf32, #tpu.memory_space<vmem>>, vector<1x128xf32>
    %cst = arith.constant dense<0.000000e+00> : vector<8xf32>
    %6 = vector.multi_reduction <add>, %3, %cst [1] : vector<8x128xf32> to vector<8xf32>
    %7 = vector.shape_cast %6 : vector<8xf32> to vector<8x1xf32>
    %cst_8 = arith.constant 1.280000e+02 : f32
    %8 = vector.broadcast %cst_8 : f32 to vector<8x1xf32>
    %9 = arith.divf %7, %8 : vector<8x1xf32>
    %10 = vector.broadcast %9 : vector<8x1xf32> to vector<8x128xf32>
    %11 = arith.subf %3, %10 : vector<8x128xf32>
    %12 = arith.mulf %11, %11 : vector<8x128xf32>
    %cst_9 = arith.constant dense<0.000000e+00> : vector<8xf32>
    %13 = vector.multi_reduction <add>, %12, %cst_9 [1] : vector<8x128xf32> to vector<8xf32>
    %14 = vector.shape_cast %13 : vector<8xf32> to vector<8x1xf32>
    %cst_10 = arith.constant 1.280000e+02 : f32
    %15 = vector.broadcast %cst_10 : f32 to vector<8x1xf32>
    %16 = arith.divf %14, %15 : vector<8x1xf32>
    %17 = vector.broadcast %9 : vector<8x1xf32> to vector<8x128xf32>
    %18 = arith.subf %3, %17 : vector<8x128xf32>
    %cst_11 = arith.constant 9.99999974E-6 : f32
    %19 = vector.broadcast %cst_11 : f32 to vector<8x1xf32>
    %20 = arith.addf %16, %19 : vector<8x1xf32>
    %21 = math.rsqrt %20 : vector<8x1xf32>
    %22 = vector.broadcast %21 : vector<8x1xf32> to vector<8x128xf32>
    %23 = arith.mulf %18, %22 : vector<8x128xf32>
    %24 = vector.broadcast %4 : vector<1x128xf32> to vector<8x128xf32>
    %25 = arith.mulf %23, %24 : vector<8x128xf32>
    %26 = vector.broadcast %5 : vector<1x128xf32> to vector<8x128xf32>
    %27 = arith.addf %25, %26 : vector<8x128xf32>
    %c0_12 = arith.constant 0 : index
    %c0_13 = arith.constant 0 : index
    %c0_14 = arith.constant 0 : index
    %28 = vector.load %arg5[%c0_12, %c0_13, %c0_14] : memref<1x8x128xf32, #tpu.memory_space<vmem>>, vector<1x8x128xf32>
    %29 = vector.shape_cast %28 : vector<1x8x128xf32> to vector<8x128xf32>
    %30 = vector.shape_cast %27 : vector<8x128xf32> to vector<1x8x128xf32>
    tpu.vector_store %arg5[%c0_12, %c0_13, %c0_14], %30 {strides = array<i32>} : memref<1x8x128xf32, #tpu.memory_space<vmem>>, vector<1x8x128xf32>,
    return
  }
  func.func @transform_0(%arg0: i32) -> (i32, i32, i32) {
    %c0_i32 = arith.constant 0 : i32
    %c0_i32_0 = arith.constant 0 : i32
    %c0_i32_1 = arith.constant 0 : i32
    return %arg0, %c0_i32, %c0_i32_0 : i32, i32, i32
  }
  func.func @transform_1(%arg0: i32) -> (i32, i32) {
    %c0_i32 = arith.constant 0 : i32
    %c0_i32_0 = arith.constant 0 : i32
    %c0_i32_1 = arith.constant 0 : i32
    return %c0_i32, %c0_i32_0 : i32, i32
  }
  func.func @transform_2(%arg0: i32) -> (i32, i32) {
    %c0_i32 = arith.constant 0 : i32
    %c0_i32_0 = arith.constant 0 : i32
    %c0_i32_1 = arith.constant 0 : i32
    return %c0_i32, %c0_i32_0 : i32, i32
  }
  func.func @transform_3(%arg0: i32) -> (i32, i32) {
    %c0_i32 = arith.constant 0 : i32
    %c0_i32_0 = arith.constant 0 : i32
    %c0_i32_1 = arith.constant 0 : i32
    return %c0_i32, %c0_i32_0 : i32, i32
  }
  func.func @transform_4(%arg0: i32) -> (i32, i32, i32) {
    %c0_i32 = arith.constant 0 : i32
    %c0_i32_0 = arith.constant 0 : i32
    %c0_i32_1 = arith.constant 0 : i32
    return %arg0, %c0_i32, %c0_i32_0 : i32, i32, i32
  }
}

module attributes {stable_mosaic.version = 11 : i64} {
  func.func @_attn_kernel(%arg0: i32, %arg1: i32, %arg2: memref<1x8x128xbf16, #tpu.memory_space<vmem>>, %arg3: memref<1x8x128xbf16, #tpu.memory_space<vmem>>, %arg4: memref<1x8x128xbf16, #tpu.memory_space<vmem>>, %arg5: memref<1x8x128xbf16, #tpu.memory_space<vmem>>) attributes {dimension_semantics = [#tpu.dimension_semantics<parallel>, #tpu.dimension_semantics<parallel>], iteration_bounds = array<i64: 2, 1>, scalar_prefetch = 0 : i64, scratch_operands = 0 : i64, tpu.core_type = #tpu.core_type<tc>, window_params = [{transform_indices = @transform_0, window_bounds = array<i64: 1, 8, 128>}, {transform_indices = @transform_1, window_bounds = array<i64: 1, 8, 128>}, {transform_indices = @transform_2, window_bounds = array<i64: 1, 8, 128>}, {transform_indices = @transform_3, window_bounds = array<i64: 1, 8, 128>}]} {
    %c0 = arith.constant 0 : index
    %c0_0 = arith.constant 0 : index
    %c0_1 = arith.constant 0 : index
    %0 = vector.load %arg2[%c0, %c0_0, %c0_1] : memref<1x8x128xbf16, #tpu.memory_space<vmem>>, vector<1x8x128xbf16>
    %1 = vector.shape_cast %0 : vector<1x8x128xbf16> to vector<8x128xbf16>
    %c0_2 = arith.constant 0 : index
    %c0_3 = arith.constant 0 : index
    %c0_4 = arith.constant 0 : index
    %2 = vector.load %arg3[%c0_2, %c0_3, %c0_4] : memref<1x8x128xbf16, #tpu.memory_space<vmem>>, vector<1x8x128xbf16>
    %3 = vector.shape_cast %2 : vector<1x8x128xbf16> to vector<8x128xbf16>
    %c0_5 = arith.constant 0 : index
    %c0_6 = arith.constant 0 : index
    %c0_7 = arith.constant 0 : index
    %4 = vector.load %arg4[%c0_5, %c0_6, %c0_7] : memref<1x8x128xbf16, #tpu.memory_space<vmem>>, vector<1x8x128xbf16>
    %5 = vector.shape_cast %4 : vector<1x8x128xbf16> to vector<8x128xbf16>
    %6 = tpu.iota {dimensions = array<i32: 1>} : vector<1x8xi32>
    %7 = vector.extract_strided_slice %1 {offsets = [0, 0], sizes = [8, 64], strides = [1, 1]} : vector<8x128xbf16> to vector<8x64xbf16>
    %8 = vector.extract_strided_slice %3 {offsets = [0, 0], sizes = [8, 64], strides = [1, 1]} : vector<8x128xbf16> to vector<8x64xbf16>
    %9 = vector.extract_strided_slice %5 {offsets = [0, 0], sizes = [8, 64], strides = [1, 1]} : vector<8x128xbf16> to vector<8x64xbf16>
    %cst = arith.constant dense<0.000000e+00> : vector<8x8xf32>
    %10 = tpu.matmul %7, %8, %cst {dimension_numbers = #tpu.dot_dimension_numbers<[1], [1], [0], [0], [0, 0, 1, 0], [], []>} : vector<8x64xbf16>, vector<8x64xbf16>, vector<8x8xf32> -> vector<8x8xf32>
    %c5_i32 = arith.constant 5 : i32
    %11 = vector.broadcast %c5_i32 : i32 to vector<1x8xi32>
    %12 = arith.cmpi slt, %6, %11 : vector<1x8xi32>
    %cst_8 = arith.constant -1.000000e+30 : f32
    %13 = vector.shape_cast %12 : vector<1x8xi1> to vector<1x8xi1>
    %14 = vector.broadcast %13 : vector<1x8xi1> to vector<8x8xi1>
    %15 = vector.broadcast %cst_8 : f32 to vector<8x8xf32>
    %16 = arith.select %14, %10, %15 : vector<8x8xi1>, vector<8x8xf32>
    %cst_9 = arith.constant dense<0xFF800000> : vector<8xf32>
    %17 = vector.multi_reduction <maximumf>, %16, %cst_9 [1] : vector<8x8xf32> to vector<8xf32>
    %18 = vector.shape_cast %17 : vector<8xf32> to vector<8x1xf32>
    %19 = vector.broadcast %18 : vector<8x1xf32> to vector<8x8xf32>
    %20 = arith.subf %16, %19 : vector<8x8xf32>
    %21 = math.exp %20 : vector<8x8xf32>
    %cst_10 = arith.constant dense<0.000000e+00> : vector<8xf32>
    %22 = vector.multi_reduction <add>, %21, %cst_10 [1] : vector<8x8xf32> to vector<8xf32>
    %23 = vector.shape_cast %22 : vector<8xf32> to vector<8x1xf32>
    %24 = tpu.reciprocal %23 {approx = true} : vector<8x1xf32> -> vector<8x1xf32>
    %25 = vector.broadcast %24 : vector<8x1xf32> to vector<8x8xf32>
    %26 = arith.mulf %21, %25 : vector<8x8xf32>
    %27 = arith.truncf %26 : vector<8x8xf32> to vector<8x8xbf16>
    %cst_11 = arith.constant dense<0.000000e+00> : vector<8x64xf32>
    %28 = tpu.matmul %27, %9, %cst_11 {dimension_numbers = #tpu.dot_dimension_numbers<[1], [0], [0], [1], [0, 0, 1, 1], [], []>} : vector<8x8xbf16>, vector<8x64xbf16>, vector<8x64xf32> -> vector<8x64xf32>
    %29 = vector.extract_strided_slice %1 {offsets = [0, 64], sizes = [8, 64], strides = [1, 1]} : vector<8x128xbf16> to vector<8x64xbf16>
    %30 = vector.extract_strided_slice %3 {offsets = [0, 64], sizes = [8, 64], strides = [1, 1]} : vector<8x128xbf16> to vector<8x64xbf16>
    %31 = vector.extract_strided_slice %5 {offsets = [0, 64], sizes = [8, 64], strides = [1, 1]} : vector<8x128xbf16> to vector<8x64xbf16>
    %cst_12 = arith.constant dense<0.000000e+00> : vector<8x8xf32>
    %32 = tpu.matmul %29, %30, %cst_12 {dimension_numbers = #tpu.dot_dimension_numbers<[1], [1], [0], [0], [0, 0, 1, 0], [], []>} : vector<8x64xbf16>, vector<8x64xbf16>, vector<8x8xf32> -> vector<8x8xf32>
    %c5_i32_13 = arith.constant 5 : i32
    %33 = vector.broadcast %c5_i32_13 : i32 to vector<1x8xi32>
    %34 = arith.cmpi slt, %6, %33 : vector<1x8xi32>
    %cst_14 = arith.constant -1.000000e+30 : f32
    %35 = vector.shape_cast %34 : vector<1x8xi1> to vector<1x8xi1>
    %36 = vector.broadcast %35 : vector<1x8xi1> to vector<8x8xi1>
    %37 = vector.broadcast %cst_14 : f32 to vector<8x8xf32>
    %38 = arith.select %36, %32, %37 : vector<8x8xi1>, vector<8x8xf32>
    %cst_15 = arith.constant dense<0xFF800000> : vector<8xf32>
    %39 = vector.multi_reduction <maximumf>, %38, %cst_15 [1] : vector<8x8xf32> to vector<8xf32>
    %40 = vector.shape_cast %39 : vector<8xf32> to vector<8x1xf32>
    %41 = vector.broadcast %40 : vector<8x1xf32> to vector<8x8xf32>
    %42 = arith.subf %38, %41 : vector<8x8xf32>
    %43 = math.exp %42 : vector<8x8xf32>
    %cst_16 = arith.constant dense<0.000000e+00> : vector<8xf32>
    %44 = vector.multi_reduction <add>, %43, %cst_16 [1] : vector<8x8xf32> to vector<8xf32>
    %45 = vector.shape_cast %44 : vector<8xf32> to vector<8x1xf32>
    %46 = tpu.reciprocal %45 {approx = true} : vector<8x1xf32> -> vector<8x1xf32>
    %47 = vector.broadcast %46 : vector<8x1xf32> to vector<8x8xf32>
    %48 = arith.mulf %43, %47 : vector<8x8xf32>
    %49 = arith.truncf %48 : vector<8x8xf32> to vector<8x8xbf16>
    %cst_17 = arith.constant dense<0.000000e+00> : vector<8x64xf32>
    %50 = tpu.matmul %49, %31, %cst_17 {dimension_numbers = #tpu.dot_dimension_numbers<[1], [0], [0], [1], [0, 0, 1, 1], [], []>} : vector<8x8xbf16>, vector<8x64xbf16>, vector<8x64xf32> -> vector<8x64xf32>
    %51 = tpu.concatenate %28, %50 in 1 : vector<8x64xf32>, vector<8x64xf32> -> vector<8x128xf32>
    %52 = arith.truncf %51 : vector<8x128xf32> to vector<8x128xbf16>
    %c0_18 = arith.constant 0 : index
    %c0_19 = arith.constant 0 : index
    %c0_20 = arith.constant 0 : index
    %53 = vector.load %arg5[%c0_18, %c0_19, %c0_20] : memref<1x8x128xbf16, #tpu.memory_space<vmem>>, vector<1x8x128xbf16>
    %54 = vector.shape_cast %53 : vector<1x8x128xbf16> to vector<8x128xbf16>
    %55 = vector.shape_cast %52 : vector<8x128xbf16> to vector<1x8x128xbf16>
    tpu.vector_store %arg5[%c0_18, %c0_19, %c0_20], %55 {strides = array<i32>} : memref<1x8x128xbf16, #tpu.memory_space<vmem>>, vector<1x8x128xbf16>,
    return
  }
  func.func @transform_0(%arg0: i32, %arg1: i32) -> (i32, i32, i32) {
    %c0_i32 = arith.constant 0 : i32
    %c0_i32_0 = arith.constant 0 : i32
    return %arg0, %c0_i32, %arg1 : i32, i32, i32
  }
  func.func @transform_1(%arg0: i32, %arg1: i32) -> (i32, i32, i32) {
    %c1_i32 = arith.constant 1 : i32
    %0 = arith.addi %c1_i32, %arg1 : i32
    %c0_i32 = arith.constant 0 : i32
    %c0_i32_0 = arith.constant 0 : i32
    return %arg0, %c0_i32, %0 : i32, i32, i32
  }
  func.func @transform_2(%arg0: i32, %arg1: i32) -> (i32, i32, i32) {
    %c2_i32 = arith.constant 2 : i32
    %0 = arith.addi %c2_i32, %arg1 : i32
    %c0_i32 = arith.constant 0 : i32
    %c0_i32_0 = arith.constant 0 : i32
    return %arg0, %c0_i32, %0 : i32, i32, i32
  }
  func.func @transform_3(%arg0: i32, %arg1: i32) -> (i32, i32, i32) {
    %c0_i32 = arith.constant 0 : i32
    %c0_i32_0 = arith.constant 0 : i32
    return %arg0, %c0_i32, %arg1 : i32, i32, i32
  }
}

module attributes {stable_mosaic.version = 11 : i64} {
  func.func @_mm_kernel(%arg0: i32, %arg1: i32, %arg2: memref<16x128xbf16, #tpu.memory_space<vmem>>, %arg3: memref<128x128xbf16, #tpu.memory_space<vmem>>, %arg4: memref<1x128xf32, #tpu.memory_space<vmem>>, %arg5: memref<16x128xf32, #tpu.memory_space<vmem>>, %arg6: memref<16x128xf32, #tpu.memory_space<vmem>>) attributes {dimension_semantics = [#tpu.dimension_semantics<parallel>, #tpu.dimension_semantics<parallel>], iteration_bounds = array<i64: 1, 1>, scalar_prefetch = 0 : i64, scratch_operands = 0 : i64, tpu.core_type = #tpu.core_type<tc>, window_params = [{transform_indices = @transform_0, window_bounds = array<i64: 16, 128>}, {transform_indices = @transform_1, window_bounds = array<i64: 128, 128>}, {transform_indices = @transform_2, window_bounds = array<i64: 1, 128>}, {transform_indices = @transform_3, window_bounds = array<i64: 16, 128>}, {transform_indices = @transform_4, window_bounds = array<i64: 16, 128>}]} {
    %c0 = arith.constant 0 : index
    %c0_0 = arith.constant 0 : index
    %0 = vector.load %arg2[%c0, %c0_0] : memref<16x128xbf16, #tpu.memory_space<vmem>>, vector<16x128xbf16>
    %c0_1 = arith.constant 0 : index
    %c0_2 = arith.constant 0 : index
    %1 = vector.load %arg3[%c0_1, %c0_2] : memref<128x128xbf16, #tpu.memory_space<vmem>>, vector<128x128xbf16>
    %cst = arith.constant dense<0.000000e+00> : vector<16x128xf32>
    %2 = tpu.matmul %0, %1, %cst {dimension_numbers = #tpu.dot_dimension_numbers<[1], [0], [0], [1], [0, 0, 1, 1], [], []>} : vector<16x128xbf16>, vector<128x128xbf16>, vector<16x128xf32> -> vector<16x128xf32>
    %c0_3 = arith.constant 0 : index
    %c0_4 = arith.constant 0 : index
    %3 = vector.load %arg4[%c0_3, %c0_4] : memref<1x128xf32, #tpu.memory_space<vmem>>, vector<1x128xf32>
    %4 = vector.broadcast %3 : vector<1x128xf32> to vector<16x128xf32>
    %5 = arith.addf %2, %4 : vector<16x128xf32>
    %c0_5 = arith.constant 0 : index
    %c0_6 = arith.constant 0 : index
    %6 = vector.load %arg5[%c0_5, %c0_6] : memref<16x128xf32, #tpu.memory_space<vmem>>, vector<16x128xf32>
    %7 = arith.addf %5, %6 : vector<16x128xf32>
    %c0_7 = arith.constant 0 : index
    %c0_8 = arith.constant 0 : index
    %8 = vector.load %arg6[%c0_7, %c0_8] : memref<16x128xf32, #tpu.memory_space<vmem>>, vector<16x128xf32>
    tpu.vector_store %arg6[%c0_7, %c0_8], %7 {strides = array<i32>} : memref<16x128xf32, #tpu.memory_space<vmem>>, vector<16x128xf32>,
    return
  }
  func.func @transform_0(%arg0: i32, %arg1: i32) -> (i32, i32) {
    %c0_i32 = arith.constant 0 : i32
    %c0_i32_0 = arith.constant 0 : i32
    return %arg0, %c0_i32 : i32, i32
  }
  func.func @transform_1(%arg0: i32, %arg1: i32) -> (i32, i32) {
    %c0_i32 = arith.constant 0 : i32
    %c0_i32_0 = arith.constant 0 : i32
    return %c0_i32, %arg1 : i32, i32
  }
  func.func @transform_2(%arg0: i32, %arg1: i32) -> (i32, i32) {
    %c0_i32 = arith.constant 0 : i32
    %c0_i32_0 = arith.constant 0 : i32
    return %c0_i32, %arg1 : i32, i32
  }
  func.func @transform_3(%arg0: i32, %arg1: i32) -> (i32, i32) {
    %c0_i32 = arith.constant 0 : i32
    return %arg0, %arg1 : i32, i32
  }
  func.func @transform_4(%arg0: i32, %arg1: i32) -> (i32, i32) {
    %c0_i32 = arith.constant 0 : i32
    return %arg0, %arg1 : i32, i32
  }
}

module attributes {stable_mosaic.version = 11 : i64} {
  func.func @_mm_kernel(%arg0: i32, %arg1: i32, %arg2: memref<16x512xbf16, #tpu.memory_space<vmem>>, %arg3: memref<512x128xbf16, #tpu.memory_space<vmem>>, %arg4: memref<1x128xf32, #tpu.memory_space<vmem>>, %arg5: memref<16x128xf32, #tpu.memory_space<vmem>>, %arg6: memref<16x128xf32, #tpu.memory_space<vmem>>) attributes {dimension_semantics = [#tpu.dimension_semantics<parallel>, #tpu.dimension_semantics<parallel>], iteration_bounds = array<i64: 1, 1>, scalar_prefetch = 0 : i64, scratch_operands = 0 : i64, tpu.core_type = #tpu.core_type<tc>, window_params = [{transform_indices = @transform_0, window_bounds = array<i64: 16, 512>}, {transform_indices = @transform_1, window_bounds = array<i64: 512, 128>}, {transform_indices = @transform_2, window_bounds = array<i64: 1, 128>}, {transform_indices = @transform_3, window_bounds = array<i64: 16, 128>}, {transform_indices = @transform_4, window_bounds = array<i64: 16, 128>}]} {
    %c0 = arith.constant 0 : index
    %c0_0 = arith.constant 0 : index
    %0 = vector.load %arg2[%c0, %c0_0] : memref<16x512xbf16, #tpu.memory_space<vmem>>, vector<16x512xbf16>
    %c0_1 = arith.constant 0 : index
    %c0_2 = arith.constant 0 : index
    %1 = vector.load %arg3[%c0_1, %c0_2] : memref<512x128xbf16, #tpu.memory_space<vmem>>, vector<512x128xbf16>
    %cst = arith.constant dense<0.000000e+00> : vector<16x128xf32>
    %2 = tpu.matmul %0, %1, %cst {dimension_numbers = #tpu.dot_dimension_numbers<[1], [0], [0], [1], [0, 0, 1, 1], [], []>} : vector<16x512xbf16>, vector<512x128xbf16>, vector<16x128xf32> -> vector<16x128xf32>
    %c0_3 = arith.constant 0 : index
    %c0_4 = arith.constant 0 : index
    %3 = vector.load %arg4[%c0_3, %c0_4] : memref<1x128xf32, #tpu.memory_space<vmem>>, vector<1x128xf32>
    %4 = vector.broadcast %3 : vector<1x128xf32> to vector<16x128xf32>
    %5 = arith.addf %2, %4 : vector<16x128xf32>
    %c0_5 = arith.constant 0 : index
    %c0_6 = arith.constant 0 : index
    %6 = vector.load %arg5[%c0_5, %c0_6] : memref<16x128xf32, #tpu.memory_space<vmem>>, vector<16x128xf32>
    %7 = arith.addf %5, %6 : vector<16x128xf32>
    %c0_7 = arith.constant 0 : index
    %c0_8 = arith.constant 0 : index
    %8 = vector.load %arg6[%c0_7, %c0_8] : memref<16x128xf32, #tpu.memory_space<vmem>>, vector<16x128xf32>
    tpu.vector_store %arg6[%c0_7, %c0_8], %7 {strides = array<i32>} : memref<16x128xf32, #tpu.memory_space<vmem>>, vector<16x128xf32>,
    return
  }
  func.func @transform_0(%arg0: i32, %arg1: i32) -> (i32, i32) {
    %c0_i32 = arith.constant 0 : i32
    %c0_i32_0 = arith.constant 0 : i32
    return %arg0, %c0_i32 : i32, i32
  }
  func.func @transform_1(%arg0: i32, %arg1: i32) -> (i32, i32) {
    %c0_i32 = arith.constant 0 : i32
    %c0_i32_0 = arith.constant 0 : i32
    return %c0_i32, %arg1 : i32, i32
  }
  func.func @transform_2(%arg0: i32, %arg1: i32) -> (i32, i32) {
    %c0_i32 = arith.constant 0 : i32
    %c0_i32_0 = arith.constant 0 : i32
    return %c0_i32, %arg1 : i32, i32
  }
  func.func @transform_3(%arg0: i32, %arg1: i32) -> (i32, i32) {
    %c0_i32 = arith.constant 0 : i32
    return %arg0, %arg1 : i32, i32
  }
  func.func @transform_4(%arg0: i32, %arg1: i32) -> (i32, i32) {
    %c0_i32 = arith.constant 0 : i32
    return %arg0, %arg1 : i32, i32
  }
}

module attributes {stable_mosaic.version = 11 : i64} {
  func.func @_mm_kernel(%arg0: i32, %arg1: i32, %arg2: memref<16x128xf32, #tpu.memory_space<vmem>>, %arg3: memref<1x128xf32, #tpu.memory_space<vmem>>, %arg4: memref<1x128xf32, #tpu.memory_space<vmem>>, %arg5: memref<128x512xbf16, #tpu.memory_space<vmem>>, %arg6: memref<1x512xf32, #tpu.memory_space<vmem>>, %arg7: memref<16x512xbf16, #tpu.memory_space<vmem>>) attributes {dimension_semantics = [#tpu.dimension_semantics<parallel>, #tpu.dimension_semantics<parallel>], iteration_bounds = array<i64: 1, 1>, scalar_prefetch = 0 : i64, scratch_operands = 0 : i64, tpu.core_type = #tpu.core_type<tc>, window_params = [{transform_indices = @transform_0, window_bounds = array<i64: 16, 128>}, {pipeline_mode = #tpu.pipeline_mode<synchronous>, transform_indices = @transform_1, window_bounds = array<i64: 1, 128>}, {pipeline_mode = #tpu.pipeline_mode<synchronous>, transform_indices = @transform_2, window_bounds = array<i64: 1, 128>}, {transform_indices = @transform_3, window_bounds = array<i64: 128, 512>}, {transform_indices = @transform_4, window_bounds = array<i64: 1, 512>}, {transform_indices = @transform_5, window_bounds = array<i64: 16, 512>}]} {
    %c0 = arith.constant 0 : index
    %c0_0 = arith.constant 0 : index
    %0 = vector.load %arg2[%c0, %c0_0] : memref<16x128xf32, #tpu.memory_space<vmem>>, vector<16x128xf32>
    %c0_1 = arith.constant 0 : index
    %c0_2 = arith.constant 0 : index
    %1 = vector.load %arg3[%c0_1, %c0_2] : memref<1x128xf32, #tpu.memory_space<vmem>>, vector<1x128xf32>
    %c0_3 = arith.constant 0 : index
    %c0_4 = arith.constant 0 : index
    %2 = vector.load %arg4[%c0_3, %c0_4] : memref<1x128xf32, #tpu.memory_space<vmem>>, vector<1x128xf32>
    %cst = arith.constant dense<0.000000e+00> : vector<16xf32>
    %3 = vector.multi_reduction <add>, %0, %cst [1] : vector<16x128xf32> to vector<16xf32>
    %4 = vector.shape_cast %3 : vector<16xf32> to vector<16x1xf32>
    %cst_5 = arith.constant 1.280000e+02 : f32
    %5 = vector.broadcast %cst_5 : f32 to vector<16x1xf32>
    %6 = arith.divf %4, %5 : vector<16x1xf32>
    %7 = vector.broadcast %6 : vector<16x1xf32> to vector<16x128xf32>
    %8 = arith.subf %0, %7 : vector<16x128xf32>
    %9 = arith.mulf %8, %8 : vector<16x128xf32>
    %cst_6 = arith.constant dense<0.000000e+00> : vector<16xf32>
    %10 = vector.multi_reduction <add>, %9, %cst_6 [1] : vector<16x128xf32> to vector<16xf32>
    %11 = vector.shape_cast %10 : vector<16xf32> to vector<16x1xf32>
    %cst_7 = arith.constant 1.280000e+02 : f32
    %12 = vector.broadcast %cst_7 : f32 to vector<16x1xf32>
    %13 = arith.divf %11, %12 : vector<16x1xf32>
    %14 = vector.broadcast %6 : vector<16x1xf32> to vector<16x128xf32>
    %15 = arith.subf %0, %14 : vector<16x128xf32>
    %cst_8 = arith.constant 9.99999974E-6 : f32
    %16 = vector.broadcast %cst_8 : f32 to vector<16x1xf32>
    %17 = arith.addf %13, %16 : vector<16x1xf32>
    %18 = math.rsqrt %17 : vector<16x1xf32>
    %19 = vector.broadcast %18 : vector<16x1xf32> to vector<16x128xf32>
    %20 = arith.mulf %15, %19 : vector<16x128xf32>
    %21 = vector.broadcast %1 : vector<1x128xf32> to vector<16x128xf32>
    %22 = arith.mulf %20, %21 : vector<16x128xf32>
    %23 = vector.broadcast %2 : vector<1x128xf32> to vector<16x128xf32>
    %24 = arith.addf %22, %23 : vector<16x128xf32>
    %25 = arith.truncf %24 : vector<16x128xf32> to vector<16x128xbf16>
    %c0_9 = arith.constant 0 : index
    %c0_10 = arith.constant 0 : index
    %26 = vector.load %arg5[%c0_9, %c0_10] : memref<128x512xbf16, #tpu.memory_space<vmem>>, vector<128x512xbf16>
    %cst_11 = arith.constant dense<0.000000e+00> : vector<16x512xf32>
    %27 = tpu.matmul %25, %26, %cst_11 {dimension_numbers = #tpu.dot_dimension_numbers<[1], [0], [0], [1], [0, 0, 1, 1], [], []>} : vector<16x128xbf16>, vector<128x512xbf16>, vector<16x512xf32> -> vector<16x512xf32>
    %c0_12 = arith.constant 0 : index
    %c0_13 = arith.constant 0 : index
    %28 = vector.load %arg6[%c0_12, %c0_13] : memref<1x512xf32, #tpu.memory_space<vmem>>, vector<1x512xf32>
    %29 = vector.broadcast %28 : vector<1x512xf32> to vector<16x512xf32>
    %30 = arith.addf %27, %29 : vector<16x512xf32>
    %cst_14 = arith.constant 1.702000e+00 : f32
    %31 = vector.broadcast %cst_14 : f32 to vector<16x512xf32>
    %32 = arith.mulf %31, %30 : vector<16x512xf32>
    %33 = arith.negf %32 : vector<16x512xf32>
    %34 = math.exp %33 : vector<16x512xf32>
    %cst_15 = arith.constant 1.000000e+00 : f32
    %35 = vector.broadcast %cst_15 : f32 to vector<16x512xf32>
    %36 = arith.addf %35, %34 : vector<16x512xf32>
    %37 = arith.divf %35, %36 : vector<16x512xf32>
    %38 = arith.mulf %30, %37 : vector<16x512xf32>
    %39 = arith.truncf %38 : vector<16x512xf32> to vector<16x512xbf16>
    %c0_16 = arith.constant 0 : index
    %c0_17 = arith.constant 0 : index
    %40 = vector.load %arg7[%c0_16, %c0_17] : memref<16x512xbf16, #tpu.memory_space<vmem>>, vector<16x512xbf16>
    tpu.vector_store %arg7[%c0_16, %c0_17], %39 {strides = array<i32>} : memref<16x512xbf16, #tpu.memory_space<vmem>>, vector<16x512xbf16>,
    return
  }
  func.func @transform_0(%arg0: i32, %arg1: i32) -> (i32, i32) {
    %c0_i32 = arith.constant 0 : i32
    %c0_i32_0 = arith.constant 0 : i32
    return %arg0, %c0_i32 : i32, i32
  }
  func.func @transform_1(%arg0: i32, %arg1: i32) -> (i32, i32) {
    %c0_i32 = arith.constant 0 : i32
    %c0_i32_0 = arith.constant 0 : i32
    %c0_i32_1 = arith.constant 0 : i32
    return %c0_i32, %c0_i32_0 : i32, i32
  }
  func.func @transform_2(%arg0: i32, %arg1: i32) -> (i32, i32) {
    %c0_i32 = arith.constant 0 : i32
    %c0_i32_0 = arith.constant 0 : i32
    %c0_i32_1 = arith.constant 0 : i32
    return %c0_i32, %c0_i32_0 : i32, i32
  }
  func.func @transform_3(%arg0: i32, %arg1: i32) -> (i32, i32) {
    %c0_i32 = arith.constant 0 : i32
    %c0_i32_0 = arith.constant 0 : i32
    return %c0_i32, %arg1 : i32, i32
  }
  func.func @transform_4(%arg0: i32, %arg1: i32) -> (i32, i32) {
    %c0_i32 = arith.constant 0 : i32
    %c0_i32_0 = arith.constant 0 : i32
    return %c0_i32, %arg1 : i32, i32
  }
  func.func @transform_5(%arg0: i32, %arg1: i32) -> (i32, i32) {
    %c0_i32 = arith.constant 0 : i32
    return %arg0, %arg1 : i32, i32
  }
}

module attributes {stable_mosaic.version = 11 : i64} {
  func.func @_head_kernel(%arg0: i32, %arg1: memref<2x128xf32, #tpu.memory_space<vmem>>, %arg2: memref<1x128xf32, #tpu.memory_space<vmem>>, %arg3: memref<1x128xf32, #tpu.memory_space<vmem>>, %arg4: memref<128x128xbf16, #tpu.memory_space<vmem>>, %arg5: memref<2x128xf32, #tpu.memory_space<vmem>>) attributes {dimension_semantics = [#tpu.dimension_semantics<arbitrary>], iteration_bounds = array<i64: 1>, scalar_prefetch = 0 : i64, scratch_operands = 0 : i64, tpu.core_type = #tpu.core_type<tc>, window_params = [{pipeline_mode = #tpu.pipeline_mode<synchronous>, transform_indices = @transform_0, window_bounds = array<i64: 2, 128>}, {pipeline_mode = #tpu.pipeline_mode<synchronous>, transform_indices = @transform_1, window_bounds = array<i64: 1, 128>}, {pipeline_mode = #tpu.pipeline_mode<synchronous>, transform_indices = @transform_2, window_bounds = array<i64: 1, 128>}, {pipeline_mode = #tpu.pipeline_mode<synchronous>, transform_indices = @transform_3, window_bounds = array<i64: 128, 128>}, {pipeline_mode = #tpu.pipeline_mode<synchronous>, transform_indices = @transform_4, window_bounds = array<i64: 2, 128>}]} {
    %c0 = arith.constant 0 : index
    %c0_0 = arith.constant 0 : index
    %0 = vector.load %arg1[%c0, %c0_0] : memref<2x128xf32, #tpu.memory_space<vmem>>, vector<2x128xf32>
    %c0_1 = arith.constant 0 : index
    %c0_2 = arith.constant 0 : index
    %1 = vector.load %arg2[%c0_1, %c0_2] : memref<1x128xf32, #tpu.memory_space<vmem>>, vector<1x128xf32>
    %c0_3 = arith.constant 0 : index
    %c0_4 = arith.constant 0 : index
    %2 = vector.load %arg3[%c0_3, %c0_4] : memref<1x128xf32, #tpu.memory_space<vmem>>, vector<1x128xf32>
    %cst = arith.constant dense<0.000000e+00> : vector<2xf32>
    %3 = vector.multi_reduction <add>, %0, %cst [1] : vector<2x128xf32> to vector<2xf32>
    %4 = vector.shape_cast %3 : vector<2xf32> to vector<2x1xf32>
    %cst_5 = arith.constant 1.280000e+02 : f32
    %5 = vector.broadcast %cst_5 : f32 to vector<2x1xf32>
    %6 = arith.divf %4, %5 : vector<2x1xf32>
    %7 = vector.broadcast %6 : vector<2x1xf32> to vector<2x128xf32>
    %8 = arith.subf %0, %7 : vector<2x128xf32>
    %9 = arith.mulf %8, %8 : vector<2x128xf32>
    %cst_6 = arith.constant dense<0.000000e+00> : vector<2xf32>
    %10 = vector.multi_reduction <add>, %9, %cst_6 [1] : vector<2x128xf32> to vector<2xf32>
    %11 = vector.shape_cast %10 : vector<2xf32> to vector<2x1xf32>
    %cst_7 = arith.constant 1.280000e+02 : f32
    %12 = vector.broadcast %cst_7 : f32 to vector<2x1xf32>
    %13 = arith.divf %11, %12 : vector<2x1xf32>
    %14 = vector.broadcast %6 : vector<2x1xf32> to vector<2x128xf32>
    %15 = arith.subf %0, %14 : vector<2x128xf32>
    %cst_8 = arith.constant 9.99999974E-6 : f32
    %16 = vector.broadcast %cst_8 : f32 to vector<2x1xf32>
    %17 = arith.addf %13, %16 : vector<2x1xf32>
    %18 = math.rsqrt %17 : vector<2x1xf32>
    %19 = vector.broadcast %18 : vector<2x1xf32> to vector<2x128xf32>
    %20 = arith.mulf %15, %19 : vector<2x128xf32>
    %21 = vector.broadcast %1 : vector<1x128xf32> to vector<2x128xf32>
    %22 = arith.mulf %20, %21 : vector<2x128xf32>
    %23 = vector.broadcast %2 : vector<1x128xf32> to vector<2x128xf32>
    %24 = arith.addf %22, %23 : vector<2x128xf32>
    %25 = arith.truncf %24 : vector<2x128xf32> to vector<2x128xbf16>
    %c0_9 = arith.constant 0 : index
    %c0_10 = arith.constant 0 : index
    %26 = vector.load %arg4[%c0_9, %c0_10] : memref<128x128xbf16, #tpu.memory_space<vmem>>, vector<128x128xbf16>
    %cst_11 = arith.constant dense<0.000000e+00> : vector<2x128xf32>
    %27 = tpu.matmul %25, %26, %cst_11 {dimension_numbers = #tpu.dot_dimension_numbers<[1], [0], [0], [1], [0, 0, 1, 1], [], []>} : vector<2x128xbf16>, vector<128x128xbf16>, vector<2x128xf32> -> vector<2x128xf32>
    %28 = arith.mulf %27, %27 : vector<2x128xf32>
    %cst_12 = arith.constant dense<0.000000e+00> : vector<2xf32>
    %29 = vector.multi_reduction <add>, %28, %cst_12 [1] : vector<2x128xf32> to vector<2xf32>
    %30 = vector.shape_cast %29 : vector<2xf32> to vector<2x1xf32>
    %31 = math.rsqrt %30 : vector<2x1xf32>
    %32 = vector.broadcast %31 : vector<2x1xf32> to vector<2x128xf32>
    %33 = arith.mulf %27, %32 : vector<2x128xf32>
    %c0_13 = arith.constant 0 : index
    %c0_14 = arith.constant 0 : index
    %34 = vector.load %arg5[%c0_13, %c0_14] : memref<2x128xf32, #tpu.memory_space<vmem>>, vector<2x128xf32>
    tpu.vector_store %arg5[%c0_13, %c0_14], %33 {strides = array<i32>} : memref<2x128xf32, #tpu.memory_space<vmem>>, vector<2x128xf32>,
    return
  }
  func.func @transform_0(%arg0: i32) -> (i32, i32) {
    %c0_i32 = arith.constant 0 : i32
    %c0_i32_0 = arith.constant 0 : i32
    %c0_i32_1 = arith.constant 0 : i32
    return %c0_i32, %c0_i32_0 : i32, i32
  }
  func.func @transform_1(%arg0: i32) -> (i32, i32) {
    %c0_i32 = arith.constant 0 : i32
    %c0_i32_0 = arith.constant 0 : i32
    %c0_i32_1 = arith.constant 0 : i32
    return %c0_i32, %c0_i32_0 : i32, i32
  }
  func.func @transform_2(%arg0: i32) -> (i32, i32) {
    %c0_i32 = arith.constant 0 : i32
    %c0_i32_0 = arith.constant 0 : i32
    %c0_i32_1 = arith.constant 0 : i32
    return %c0_i32, %c0_i32_0 : i32, i32
  }
  func.func @transform_3(%arg0: i32) -> (i32, i32) {
    %c0_i32 = arith.constant 0 : i32
    %c0_i32_0 = arith.constant 0 : i32
    %c0_i32_1 = arith.constant 0 : i32
    return %c0_i32, %c0_i32_0 : i32, i32
  }
  func.func @transform_4(%arg0: i32) -> (i32, i32) {
    %c0_i32 = arith.constant 0 : i32
    %c0_i32_0 = arith.constant 0 : i32
    %c0_i32_1 = arith.constant 0 : i32
    return %c0_i32, %c0_i32_0 : i32, i32
  }
}

</mosaic_0001>

<bundles_post_ra>
// kernel: visual_encoder_forward.14
= control target key start
LH: loop header
LB: loop body
LE: loop exit
PB: predicated region body
PF: predicated region fallthrough
CT: control target
= control target key end

     0   :  { %s332_s15 = smov 0   ;;  %s358_s0 = inlined_call_operand.vmem [shape: f32[2,8,128], index: 0, kind: input, shape index: {}]   ;;  %s359_s1 = inlined_call_operand.vmem [shape: f32[8,128], index: 1, kind: input, shape index: {}]   ;;  %s360_s2 = inlined_call_operand.vmem [shape: f32[1,128], index: 2, kind: input, shape index: {}]   ;;  %s361_s3 = inlined_call_operand.vmem [shape: f32[1,128], index: 3, kind: input, shape index: {}]   ;;  %s362_s4 = inlined_call_operand.vmem [shape: f32[2,8,128], index: 4, kind: output, shape index: {}]  }
   0x1 LB: > { %s278_s16 = sadd.s32 4294967295, %s305_s15   ;;  %p282_p0 = scmp.ge.s32.totalorder %s305_s15, 1  ;;  %s305_s15 = sphi %s332_s15, %s14_s15  }
   0x2   : > { %p161_p1 = scmp.lt.s32.totalorder %s305_s15, 3 }
   0x4   : > { %p162_p2 = pnand %p282_p0, %p161_p1 }
   0x5   : > { %p185_p3 = scmp.lt.s32.totalorder (!%p162_p2), %s278_s16, 1  ;;  %v194_v0 = vld [vmem:[%s359_s1] sm:$0xff] (!%p162_p2) }
   0x6   : > { %165 = sbr.rel (%p162_p2) target bundleno = 331 (0x14b), region = 36  ;;  %v285_v11 = vld [vmem:[%s360_s2] ss:$0 sm:$0xff] (!%p162_p2) }
   0x7   : > { %v286_v13 = vld [vmem:[%s361_s3] ss:$0 sm:$0xff] (!%p162_p2) }
   0xd   : > { %s364_s16 = smov (!%p185_p3, %s278_s16), 1 }
   0xe   : > { %s283_s17 = sshll.u32 %s364_s16, 3 }
   0xf   : > { %s188_s22 = scalar_lea.vmem %s358_s0, %s283_s17  ;;  %s192_s29 = scalar_lea.vmem %s362_s4, %s283_s17 }
  0x10   : > { %v193_v1 = vld [vmem:[%s188_s22] sm:$0xff] }
  0x11   : > { %v195_v2 = vadd.f32 %v194_v0, %v193_v1 }
  0x13   : > { %198 = vadd.xlane.f32.xlu0 %v195_v2 }
  0xa0   : > { %v199_v3 = vpop.xlane.xlu0 %198 }
  0xa1   : > { %v201_v4 = vmul.f32 0.0078125, %v199_v3 }
  0xa3   : > { %v202_v5 = vsub.f32 %v195_v2, %v201_v4 }
  0xa5   : > { %v203_v6 = vmul.f32 %v202_v5, %v202_v5 }
  0xa7   : > { %204 = vadd.xlane.f32.xlu0 %v203_v6 }
 0x134   : > { %v205_v7 = vpop.xlane.xlu0 %204 }
 0x135   : > { %v206_v8 = vmul.f32 0.0078125, %v205_v7 }
 0x137   : > { %v207_v9 = vadd.f32 1e-05, %v206_v8 }
 0x139   : > { %297 = vrsqrt.f32 %v207_v9 }
 0x143   : > { %v298_v10 = vpop.eup %297 }
 0x144   : > { %v209_v12 = vmul.f32 %v298_v10, %v202_v5 }
 0x146   : > { %v216_v14 = vmul.f32 %v285_v11, %v209_v12 }
 0x148   : > { %v223_v15 = vadd.f32 %v286_v13, %v216_v14 }
 0x14a   : > { %224 = vst [vmem:[%s192_s29] sm:$0xff] %v223_v15 }
 0x14b PF: > { %s14_s15 = sadd.s32 1, %s305_s15  }
 0x14c   : > { %p11_p4 = scmp.ge.s32.totalorder %s14_s15, 4  }
 0x14e   :  { %13 = sbr.rel (!%p11_p4) target bundleno = 1 (0x1), region = 66 }

// kernel: visual_encoder_forward.13
= control target key start
LH: loop header
LB: loop body
LE: loop exit
PB: predicated region body
PF: predicated region fallthrough
CT: control target
= control target key end

     0   :  { %v198_v0 = vmov 0   ;;  %vm122_vm0 = vcmask 523264   ;;  %s267_s1 = inlined_call_operand.vmem [shape: bf16[192,128], index: 1, kind: input, shape index: {}]   ;;  %s268_s0 = inlined_call_operand.vmem [shape: f32[8,192], index: 0, kind: input, shape index: {}]   ;;  %s269_s2 = inlined_call_operand.vmem [shape: f32[1,128], index: 2, kind: input, shape index: {}]   ;;  %s270_s3 = inlined_call_operand.vmem [shape: f32[8,128], index: 3, kind: output, shape index: {}]  }
   0x1   :  { %126 = vmatprep.subr.bf16.mxu0 %v198_v0  ;;  %v186_v1 = vld [vmem:[%s267_s1] sm:$0xff]   ;;  %v187_v2 = vld [vmem:[%s267_s1 + $0x8] sm:$0xff]   ;;  %v188_v3 = vld [vmem:[%s267_s1 + $0x10] sm:$0xff]  }
   0x2   :  { %127 = vmatpush1.bf16.msra.mxu0 %v186_v1  ;;  %v189_v4 = vld [vmem:[%s267_s1 + $0x18] sm:$0xff]   ;;  %v16_v5 = vld [vmem:[%s268_s0 + $0x8] sm:$0xff]  ;;  %v190_v7 = vld [vmem:[%s267_s1 + $0x20] sm:$0xff]  }
   0x3   :  { %128 = vmatprep.subr.bf16.mxu0 %v198_v0  ;;  %v18_v6 = vpack.c.bf16 %v16_v5, %v16_v5  ;;  %v191_v8 = vld [vmem:[%s267_s1 + $0x28] sm:$0xff]   ;;  %v192_v9 = vld [vmem:[%s267_s1 + $0x30] sm:$0xff]   ;;  %v193_v10 = vld [vmem:[%s267_s1 + $0x38] sm:$0xff]  }
   0x4   :  { %v194_v11 = vld [vmem:[%s267_s1 + $0x40] sm:$0xff]   ;;  %v195_v12 = vld [vmem:[%s267_s1 + $0x48] sm:$0xff]   ;;  %v196_v13 = vld [vmem:[%s267_s1 + $0x50] sm:$0xff]  }
   0x5   :  { %184 = vmatprep.mubr.msk.bf16.mxu0 %vm122_vm0, %v18_v6  ;;  %v197_v14 = vld [vmem:[%s267_s1 + $0x58] sm:$0xff]   ;;  %v15_v15 = vld [vmem:[%s268_s0] sm:$0xff] }
   0x6   :  { %129 = vmatpush1.bf16.msra.mxu0 %v187_v2  ;;  %v17_v16 = vpack.c.bf16 %v15_v15, %v15_v15  ;;  %v171_v17 = vld [vmem:[%s269_s2] ss:$0 sm:$0xff] }
   0x7   :  { %130 = vmatprep.subr.bf16.mxu0 %v198_v0 }
   0xa   :  { %131 = vmatpush1.bf16.msra.mxu0 %v188_v3 }
   0xb   :  { %132 = vmatprep.subr.bf16.mxu0 %v198_v0 }
   0xe   :  { %133 = vmatpush1.bf16.msra.mxu0 %v189_v4 }
   0xf   :  { %134 = vmatprep.subr.bf16.mxu0 %v198_v0 }
  0x12   :  { %135 = vmatpush1.bf16.msra.mxu0 %v190_v7 }
  0x13   :  { %136 = vmatprep.subr.bf16.mxu0 %v198_v0 }
  0x16   :  { %137 = vmatpush1.bf16.msra.mxu0 %v191_v8 }
  0x17   :  { %138 = vmatprep.subr.bf16.mxu0 %v198_v0 }
  0x1a   :  { %139 = vmatpush1.bf16.msra.mxu0 %v192_v9 }
  0x1b   :  { %140 = vmatprep.subr.bf16.mxu0 %v198_v0 }
  0x1e   :  { %141 = vmatpush1.bf16.msra.mxu0 %v193_v10 }
  0x1f   :  { %142 = vmatprep.subr.bf16.mxu0 %v198_v0 }
  0x22   :  { %143 = vmatpush1.bf16.msra.mxu0 %v194_v11 }
  0x23   :  { %144 = vmatprep.subr.bf16.mxu0 %v198_v0 }
  0x26   :  { %145 = vmatpush1.bf16.msra.mxu0 %v195_v12 }
  0x27   :  { %146 = vmatprep.subr.bf16.mxu0 %v198_v0 }
  0x2a   :  { %147 = vmatpush1.bf16.msra.mxu0 %v196_v13 }
  0x2b   :  { %148 = vmatprep.subr.bf16.mxu0 %v198_v0 }
  0x2e   :  { %149 = vmatpush1.bf16.msra.mxu0 %v197_v14 }
  0x31   :  { %159 = vmatmul.mubr.bf16.vlgmr.msra.gmra.mrb[0].mxu0 %v17_v16 }
 0x104   :  { %v160_v18 = vpop.f32.mrb[0].mxu0 }
 0x105   :  { %v161_v19 = vadd.f32 %v171_v17, %v160_v18  ;;  %v162_v20 = vpop.f32.mrb[1].mxu0 }
 0x106   :  { %v163_v21 = vpop.f32.mrb[2].mxu0 }
 0x107   :  { %166 = vst [vmem:[%s270_s3] sm:$0xff] %v161_v19  ;;  %v164_v22 = vpop.f32.mrb[3].mxu0 }

// kernel: visual_encoder_forward.15
= control target key start
LH: loop header
LB: loop body
LE: loop exit
PB: predicated region body
PF: predicated region fallthrough
CT: control target
= control target key end

     0   :  { %v456_v3 = vmov 0.0   ;;  %v457_v30 = vmov 0   ;;  %vm458_vm0 = vmmov 0   ;;  %v99_v53 = vlaneseq  ;;  %s607_s0 = inlined_call_operand.vmem [shape: f32[16,128], index: 0, kind: input, shape index: {}]   ;;  %s608_s3 = inlined_call_operand.vmem [shape: bf16[128,384], index: 3, kind: input, shape index: {}]   ;;  %s609_s1 = inlined_call_operand.vmem [shape: f32[1,128], index: 1, kind: input, shape index: {}]   ;;  %s610_s2 = inlined_call_operand.vmem [shape: f32[1,128], index: 2, kind: input, shape index: {}]   ;;  %s611_s4 = inlined_call_operand.vmem [shape: f32[1,384], index: 4, kind: input, shape index: {}]   ;;  %s612_s5 = inlined_call_operand.vmem [shape: bf16[16,384], index: 5, kind: output, shape index: {}]  }
   0x1   :  { %v21_v0 = vld [vmem:[%s607_s0] sm:$0xff]  ;;  %v22_v1 = vld [vmem:[%s607_s0 + $0x8] sm:$0xff]  ;;  %397 = vmatprep.subr.bf16.mxu1 %v456_v3  ;;  %v430_v18 = vld [vmem:[%s608_s3 + $0x30] ss:$12 sps:$4 sm:$0xff]   ;;  %274 = vmatprep.mubr.bf16.mxu0 %v457_v30 }
   0x2   :  { %25 = vadd.xlane.f32.xlu0 %v21_v0  ;;  %v420_v2 = vld [vmem:[%s608_s3 + $0x4] ss:$12 sps:$4 sm:$0xff]   ;;  %v422_v4 = vld [vmem:[%s608_s3] ss:$12 sps:$4 sm:$0xff]   ;;  %v423_v5 = vld [vmem:[%s608_s3 + $0x8] ss:$12 sps:$4 sm:$0xff]   ;;  %413 = vmatprep.mubr.msk.bf16.mxu1 %vm458_vm0, %v456_v3 }
   0x3   :  { %242 = vmatprep.subr.bf16.mxu0 %v420_v2  ;;  %v424_v6 = vld [vmem:[%s608_s3 + $0x1c] ss:$12 sps:$4 sm:$0xff]   ;;  %398 = vmatpush3.bf16.msra.mxu1 %v423_v5  ;;  %v426_v15 = vld [vmem:[%s608_s3 + $0x18] ss:$12 sps:$4 sm:$0xff]   ;;  %v427_v16 = vld [vmem:[%s608_s3 + $0x20] ss:$12 sps:$4 sm:$0xff]  }
   0x4   :  { %243 = vmatpush1.bf16.msra.mxu0 %v422_v4  ;;  %399 = vmatprep.subr.bf16.mxu1 %v456_v3  ;;  %v428_v17 = vld [vmem:[%s608_s3 + $0x34] ss:$12 sps:$4 sm:$0xff]   ;;  %v431_v19 = vld [vmem:[%s608_s3 + $0x38] ss:$12 sps:$4 sm:$0xff]   ;;  %v435_v22 = vld [vmem:[%s608_s3 + $0x50] ss:$12 sps:$4 sm:$0xff]  }
   0x5   :  { %244 = vmatprep.subr.bf16.mxu0 %v424_v6  ;;  %v432_v20 = vld [vmem:[%s608_s3 + $0x4c] ss:$12 sps:$4 sm:$0xff]   ;;  %v434_v21 = vld [vmem:[%s608_s3 + $0x48] ss:$12 sps:$4 sm:$0xff]   ;;  %v436_v23 = vld [vmem:[%s608_s3 + $0x64] ss:$12 sps:$4 sm:$0xff]  }
   0x6   :  { %27 = vadd.xlane.f32.xlu0 %v22_v1  ;;  %v438_v24 = vld [vmem:[%s608_s3 + $0x60] ss:$12 sps:$4 sm:$0xff]   ;;  %v439_v25 = vld [vmem:[%s608_s3 + $0x68] ss:$12 sps:$4 sm:$0xff]   ;;  %v442_v27 = vld [vmem:[%s608_s3 + $0x78] ss:$12 sps:$4 sm:$0xff]  }
   0x7   :  { %400 = vmatpush3.bf16.msra.mxu1 %v427_v16  ;;  %v440_v26 = vld [vmem:[%s608_s3 + $0x7c] ss:$12 sps:$4 sm:$0xff]   ;;  %v443_v28 = vld [vmem:[%s608_s3 + $0x80] ss:$12 sps:$4 sm:$0xff]   ;;  %v447_v32 = vld [vmem:[%s608_s3 + $0x98] ss:$12 sps:$4 sm:$0xff]  }
   0x8   :  { %245 = vmatpush1.bf16.msra.mxu0 %v426_v15  ;;  %401 = vmatprep.subr.bf16.mxu1 %v456_v3  ;;  %v444_v29 = vld [vmem:[%s608_s3 + $0x94] ss:$12 sps:$4 sm:$0xff]   ;;  %v446_v31 = vld [vmem:[%s608_s3 + $0x90] ss:$12 sps:$4 sm:$0xff]   ;;  %v448_v33 = vld [vmem:[%s608_s3 + $0xac] ss:$12 sps:$4 sm:$0xff]  }
   0x9   :  { %246 = vmatprep.subr.bf16.mxu0 %v428_v17  ;;  %v450_v34 = vld [vmem:[%s608_s3 + $0xa8] ss:$12 sps:$4 sm:$0xff]   ;;  %v451_v35 = vld [vmem:[%s608_s3 + $0xb0] ss:$12 sps:$4 sm:$0xff]   ;;  %v354_v44 = vld [vmem:[%s609_s1] ss:$0 sm:$0xff] }
   0xa   :  { %v355_v48 = vld [vmem:[%s610_s2] ss:$0 sm:$0xff]  ;;  %v100_v54 = vshrl.u32 %v99_v53, 7 }
   0xb   :  { %402 = vmatpush3.bf16.msra.mxu1 %v431_v19  ;;  %v97_v57 = vld [vmem:[%s611_s4] sm:$0x7] }
   0xc   :  { %247 = vmatpush1.bf16.msra.mxu0 %v430_v18  ;;  %403 = vmatprep.subr.bf16.mxu1 %v456_v3  ;;  %v101_v55 = vsub.s32 0, %v100_v54  ;;  %v109_v56 = vsub.s32 2, %v100_v54  ;;  %v105_v58 = vsub.s32 1, %v100_v54 }
   0xd   :  { %248 = vmatprep.subr.bf16.mxu0 %v432_v20 }
   0xe   :  { %v102_v59 = vrot.slane %v97_v57, %v101_v55  ;;  %v110_v60 = vrot.slane %v97_v57, %v109_v56  ;;  %v106_v61 = vrot.slane %v97_v57, %v105_v58 }
   0xf   :  { %404 = vmatpush3.bf16.msra.mxu1 %v435_v22 }
  0x10   :  { %249 = vmatpush1.bf16.msra.mxu0 %v434_v21  ;;  %405 = vmatprep.subr.bf16.mxu1 %v456_v3 }
  0x11   :  { %250 = vmatprep.subr.bf16.mxu0 %v436_v23 }
  0x13   :  { %406 = vmatpush3.bf16.msra.mxu1 %v439_v25 }
  0x14   :  { %251 = vmatpush1.bf16.msra.mxu0 %v438_v24  ;;  %407 = vmatprep.subr.bf16.mxu1 %v456_v3 }
  0x15   :  { %252 = vmatprep.subr.bf16.mxu0 %v440_v26 }
  0x17   :  { %408 = vmatpush3.bf16.msra.mxu1 %v443_v28 }
  0x18   :  { %253 = vmatpush1.bf16.msra.mxu0 %v442_v27  ;;  %409 = vmatprep.subr.bf16.mxu1 %v456_v3 }
  0x19   :  { %254 = vmatprep.subr.bf16.mxu0 %v444_v29 }
  0x1b   :  { %410 = vmatpush3.bf16.msra.mxu1 %v447_v32 }
  0x1c   :  { %255 = vmatpush1.bf16.msra.mxu0 %v446_v31  ;;  %411 = vmatprep.subr.bf16.mxu1 %v456_v3 }
  0x1d   :  { %256 = vmatprep.subr.bf16.mxu0 %v448_v33 }
  0x1f   :  { %412 = vmatpush3.bf16.msra.mxu1 %v451_v35 }
  0x20   :  { %257 = vmatpush1.bf16.msra.mxu0 %v450_v34 }
  0x8f   :  { %v26_v7 = vpop.xlane.xlu0 %25 }
  0x90   :  { %v30_v8 = vmul.f32 0.0078125, %v26_v7 }
  0x92   :  { %v509_v9 = vsub.f32 %v21_v0, %v30_v8 }
  0x93   :  { %v28_v10 = vpop.xlane.xlu0 %27 }
  0x94   :  { %v31_v11 = vmul.f32 0.0078125, %v28_v10  ;;  %v34_v12 = vmul.f32 %v509_v9, %v509_v9 }
  0x96   :  { %v513_v13 = vsub.f32 %v22_v1, %v31_v11  ;;  %36 = vadd.xlane.f32.xlu1 %v34_v12 }
  0x98   :  { %v35_v14 = vmul.f32 %v513_v13, %v513_v13 }
  0x9a   :  { %38 = vadd.xlane.f32.xlu1 %v35_v14 }
 0x123   :  { %v37_v36 = vpop.xlane.xlu1 %36 }
 0x124   :  { %v40_v37 = vmul.f32 0.0078125, %v37_v36 }
 0x126   :  { %v42_v38 = vadd.f32 1e-05, %v40_v37 }
 0x127   :  { %v39_v39 = vpop.xlane.xlu1 %38 }
 0x128   :  { %452 = vrsqrt.f32 %v42_v38  ;;  %v41_v40 = vmul.f32 0.0078125, %v39_v39 }
 0x12a   :  { %v43_v41 = vadd.f32 1e-05, %v41_v40 }
 0x12c   :  { %454 = vrsqrt.f32 %v43_v41 }
 0x132   :  { %v453_v42 = vpop.eup %452 }
 0x133   :  { %v46_v43 = vmul.f32 %v453_v42, %v509_v9 }
 0x135   :  { %v54_v47 = vmul.f32 %v354_v44, %v46_v43 }
 0x136   :  { %v455_v45 = vpop.eup %454 }
 0x137   :  { %v47_v46 = vmul.f32 %v455_v45, %v513_v13  ;;  %v62_v50 = vadd.f32 %v355_v48, %v54_v47 }
 0x139   :  { %v55_v49 = vmul.f32 %v354_v44, %v47_v46 }
 0x13b   :  { %v63_v51 = vadd.f32 %v355_v48, %v55_v49 }
 0x13d   :  { %v64_v52 = vpack.c.bf16 %v63_v51, %v62_v50 }
 0x13f   :  { %275 = vmatmul.mubr.bf16.vlgmr.msra.gmra.mrb[0].mxu0 %v64_v52  ;;  %414 = vmatmul.mubr.bf16.vlgmr.msra.gmra.mrb[0].mxu1 %v64_v52 }
 0x212   :  { %v276_v62 = vpop.f32.mrb[0].mxu0  ;;  %v319_v63 = vpop.f32.mrb[0].mxu1 }
 0x213   :  { %v277_v0 = vadd.f32 %v276_v62, %v102_v59  ;;  %v320_v1 = vadd.f32 %v319_v63, %v110_v60  ;;  %v278_v2 = vpop.f32.mrb[1].mxu0  ;;  %v415_v3 = vpop.f32.mrb[1].mxu1 }
 0x214   :  { %v279_v4 = vadd.f32 %v278_v2, %v106_v61  ;;  %v280_v5 = vpop.f32.mrb[2].mxu0  ;;  %v322_v6 = vpop.f32.mrb[2].mxu1 }
 0x215   :  { %v385_v7 = vpack.c.bf16 %v320_v1, %v320_v1  ;;  %v281_v8 = vadd.f32 %v280_v5, %v102_v59  ;;  %v323_v9 = vadd.f32 %v322_v6, %v110_v60  ;;  %v282_v10 = vpop.f32.mrb[3].mxu0  ;;  %v416_v11 = vpop.f32.mrb[3].mxu1 }
 0x216   :  { %v384_v12 = vpack.c.bf16 %v279_v4, %v277_v0  ;;  %v283_v13 = vadd.f32 %v282_v10, %v106_v61 }
 0x217   :  { %347 = vst [vmem:[%s612_s5 + $0x8] sm:$0xf] %v385_v7  ;;  %v387_v14 = vpack.c.bf16 %v323_v9, %v323_v9 }
 0x218   :  { %346 = vst [vmem:[%s612_s5] sm:$0xff] %v384_v12  ;;  %v386_v15 = vpack.c.bf16 %v283_v13, %v281_v8 }
 0x219   :  { %349 = vst [vmem:[%s612_s5 + $0x14] sm:$0xf] %v387_v14 }
 0x21a   :  { %348 = vst [vmem:[%s612_s5 + $0xc] sm:$0xff] %v386_v15 }

// kernel: visual_encoder_forward.16
= control target key start
LH: loop header
LB: loop body
LE: loop exit
PB: predicated region body
PF: predicated region fallthrough
CT: control target
= control target key end

     0   :  { %s775_s12 = smov 0   ;;  %s777_s13 = smov 0   ;;  %s846_s0 = inlined_call_operand.vmem [shape: bf16[2,8,384], index: 0, kind: input, shape index: {}, may-alias: {0,1,2}]   ;;  %s847_s1 = inlined_call_operand.vmem [shape: bf16[2,8,384], index: 1, kind: input, shape index: {}, may-alias: {0,1,2}]   ;;  %s848_s2 = inlined_call_operand.vmem [shape: bf16[2,8,384], index: 2, kind: input, shape index: {}, may-alias: {0,1,2}]   ;;  %s849_s3 = inlined_call_operand.vmem [shape: bf16[2,8,128], index: 3, kind: output, shape index: {}]  }
   0x1   :  { %s779_s14 = smov 0  }
   0x2 LB: > { %s25_s15 = sadd.s32 1, %s746_s13  ;;  %p637_p0 = scmp.ge.s32.totalorder %s750_s14, 1  ;;  %s750_s14 = sphi %s779_s14, %s13_s14   ;;  %s746_s13 = sphi %s777_s13, %s851_s13   ;;  %s742_s12 = sphi %s775_s12, %s850_s12  }
   0x3   : > { %p27_p1 = scmp.ge.s32.totalorder %s25_s15, 2  ;;  %p194_p2 = scmp.lt.s32.totalorder %s750_s14, 3 }
   0x5   : > { %s853_s15 = smov (%p27_p1, %s25_s15), 0  ;;  %p195_p3 = pnand %p637_p0, %p194_p2 }
   0x6   : > { %p241_p4 = scmp.lt.s32.totalorder (!%p195_p3), %s742_s12, 1  ;;  %v752_v0 = vmov (!%p195_p3), 0.0   ;;  %vm753_vm0 = vmmov (!%p195_p3), 0   ;;  %vm282_vm1 = vcmask (!%p195_p3), 523264   ;;  %v280_v4 = vlaneseq (!%p195_p3)  ;;  %s754_s24 = smov (!%p195_p3), 64  }
   0x7   : > { %198 = sbr.rel (%p195_p3) target bundleno = 1425 (0x591), region = 32  ;;  %663 = vmatprep.subr.bf16.mxu0 (!%p195_p3), %v752_v0  ;;  %665 = vmatprep.mubr.msk.bf16.mxu0 (!%p195_p3), %vm753_vm0, %v752_v0  ;;  %vm333_vm3 = vcmask (!%p195_p3), 64512   ;;  %vm349_vm4 = vcmask (!%p195_p3), 1043456  }
   0x8   : > { %669 = vmatprep.subr.bf16.mxu1 (!%p195_p3), %v752_v0  ;;  %671 = vmatprep.mubr.msk.bf16.mxu1 (!%p195_p3), %vm753_vm0, %v752_v0  ;;  %v281_v5 = vand.u32 (!%p195_p3), 127, %v280_v4 }
   0xa   : > { %vm329_vm2 = vcmp.lt.s32.totalorder (!%p195_p3), %v281_v5, 5 }
   0xe   : > { %s855_s12 = smov (!%p241_p4, %s742_s12), 1 }
   0xf   : > { %s798_s16 = smul.u32 12, %s855_s12  ;;  %s641_s29 = sshll.u32 %s855_s12, 2 }
  0x10   : > { %s275_s5 = scalar_lea.vmem %s849_s3, %s641_s29 }
  0x11   : > { %s652_s17 = sadd.s32 4, %s798_s16  ;;  %s248_s23 = scalar_lea.vmem %s846_s0, %s798_s16 }
  0x12   : > { %s257_s20 = scalar_lea.vmem %s847_s1, %s652_s17  ;;  %v277_v3 = vld [vmem:[%s248_s23] sm:$0xf]  ;;  %s654_s25 = sadd.s32 8, %s798_s16 }
  0x13   : > { %v278_v1 = vld [vmem:[%s257_s20] sm:$0xf]  ;;  %v644_v13 = vcombine.low %v277_v3, %v277_v3  ;;  %s267_s28 = scalar_lea.vmem %s848_s2, %s654_s25 }
  0x14   : > { %v287_v2 = vsel %vm282_vm1, %v278_v1, 0  ;;  %v645_v12 = vcombine.low %v278_v1, %v278_v1  ;;  %v279_v19 = vld [vmem:[%s267_s28] sm:$0xf] }
  0x15   : > { %664 = vmatpush3.bf16.xpose.msra.mxu0 %v287_v2  ;;  %v351_v20 = vsel %vm349_vm4, %v279_v19, 0  ;;  %v647_v38 = vcombine.low %v279_v19, %v279_v19 }
  0x16   : > { %681 = vmatprep.subr.bf16.mxu0 %v752_v0  ;;  %401 = vrot.lane.b32.xlu1 %v645_v12, %s754_s24 }
  0x17   : > { %670 = vmatpush3.bf16.msra.mxu1 %v351_v20 }
  0x18   : > { %675 = vmatprep.subr.bf16.mxu1 %v752_v0 }
  0x1a   : > { %396 = vrot.lane.b32.xlu1 %v644_v13, %s754_s24 }
  0x1c   : > { %666 = vmatmul.mubr.msk.bf16.vlgmr.msra.gmra.mrb[0].mxu0 %vm282_vm1, %v277_v3 }
  0x1d   : > { %683 = vmatprep.mubr.msk.bf16.mxu0 %vm753_vm0, %v752_v0 }
  0x88   : > { %v402_v23 = vpop.permute.xlu1 %401 }
  0x89   : > { %v407_v25 = vsel %vm282_vm1, %v402_v23, 0 }
  0x8c   : > { %v397_v27 = vpop.permute.xlu1 %396 }
  0xef   : > { %v323_v6 = vpop.f32.mrb[0].mxu0 }
  0xf0   : > { %v332_v7 = vsel %vm329_vm2, %v323_v6, -1e+30  ;;  %v667_v8 = vpop.f32.mrb[1].mxu0 }
  0xf1   : > { %v326_v9 = vpop.f32.mrb[2].mxu0  ;;  %v334_v10 = vsel %vm333_vm3, %v332_v7, -inf }
  0xf2   : > { %335 = vmax.xlane.f32.xlu0 %v334_v10  ;;  %v668_v11 = vpop.f32.mrb[3].mxu0 }
 0x17f   : > { %v336_v14 = vpop.xlane.xlu0 %335 }
 0x180   : > { %v337_v15 = vsub.f32 %v332_v7, %v336_v14 }
 0x182   : > { %v338_v16 = vmul.f32 1.442695, %v337_v15 }
 0x184   : > { %720 = vpow2.f32 %v338_v16 }
 0x18e   : > { %v721_v17 = vpop.eup %720 }
 0x18f   : > { %v340_v18 = vsel %vm333_vm3, %v721_v17, 0.0 }
 0x190   : > { %341 = vadd.xlane.f32.xlu0 %v340_v18 }
 0x21d   : > { %v342_v21 = vpop.xlane.xlu0 %341 }
 0x21e   : > { %722 = vrcp.f32 %v342_v21 }
 0x228   : > { %v723_v22 = vpop.eup %722 }
 0x229   : > { %v344_v24 = vmul.f32 %v723_v22, %v721_v17 }
 0x22b   : > { %v345_v26 = vpack.c.bf16 %v344_v24, %v344_v24 }
 0x22d   : > { %672 = vmatmul.mubr.msk.bf16.vlgmr.msra.gmra.mrb[0].mxu1 %vm333_vm3, %v345_v26 }
 0x22e   : > { %676 = vmatpush3.bf16.xpose.msra.mxu1 %v407_v25  ;;  %677 = vmatprep.mubr.msk.bf16.mxu1 %vm753_vm0, %v752_v0 }
 0x235   : > { %678 = vmatmul.mubr.msk.bf16.vlgmr.msra.gmra.mrb[4].mxu1 %vm282_vm1, %v397_v27 }
 0x300   : > { %v387_v28 = vpop.f32.mrb[0].mxu1 }
 0x301   : > { %v673_v29 = vpop.f32.mrb[1].mxu1 }
 0x302   : > { %v390_v30 = vpop.f32.mrb[2].mxu1 }
 0x303   : > { %v674_v31 = vpop.f32.mrb[3].mxu1 }
 0x308   : > { %v443_v32 = vpop.f32.mrb[4].mxu1 }
 0x309   : > { %v449_v33 = vsel %vm329_vm2, %v443_v32, -1e+30  ;;  %v679_v34 = vpop.f32.mrb[5].mxu1 }
 0x30a   : > { %v446_v35 = vpop.f32.mrb[6].mxu1  ;;  %v450_v36 = vsel %vm333_vm3, %v449_v33, -inf }
 0x30b   : > { %451 = vmax.xlane.f32.xlu0 %v450_v36  ;;  %v680_v37 = vpop.f32.mrb[7].mxu1 }
 0x321   : > { %465 = vrot.lane.b32.xlu0 %v647_v38, %s754_s24 }
 0x398   : > { %v452_v39 = vpop.xlane.xlu0 %451 }
 0x399   : > { %v453_v40 = vsub.f32 %v449_v33, %v452_v39 }
 0x39b   : > { %v454_v41 = vmul.f32 1.442695, %v453_v40 }
 0x39c   : > { %v466_v44 = vpop.permute.xlu0 %465 }
 0x39d   : > { %724 = vpow2.f32 %v454_v41  ;;  %v471_v45 = vsel %vm349_vm4, %v466_v44, 0 }
 0x39e   : > { %682 = vmatpush3.bf16.msra.mxu0 %v471_v45 }
 0x3a7   : > { %v725_v42 = vpop.eup %724 }
 0x3a8   : > { %v456_v43 = vsel %vm333_vm3, %v725_v42, 0.0 }
 0x3a9   : > { %457 = vadd.xlane.f32.xlu1 %v456_v43 }
 0x436   : > { %v458_v46 = vpop.xlane.xlu1 %457 }
 0x437   : > { %726 = vrcp.f32 %v458_v46 }
 0x441   : > { %v727_v47 = vpop.eup %726 }
 0x442   : > { %v460_v48 = vmul.f32 %v727_v47, %v725_v42 }
 0x444   : > { %v461_v49 = vpack.c.bf16 %v460_v48, %v460_v48 }
 0x446   : > { %684 = vmatmul.mubr.msk.bf16.vlgmr.msra.gmra.mrb[4].mxu0 %vm333_vm3, %v461_v49 }
 0x519   : > { %v507_v50 = vpop.f32.mrb[4].mxu0 }
 0x51a   : > { %514 = vrot.lane.b32.xlu0 %v507_v50, %s754_s24  ;;  %v685_v51 = vpop.f32.mrb[5].mxu0 }
 0x51b   : > { %v510_v52 = vpop.f32.mrb[6].mxu0 }
 0x51c   : > { %v686_v53 = vpop.f32.mrb[7].mxu0 }
 0x58c   : > { %v515_v54 = vpop.permute.xlu0 %514 }
 0x58d   : > { %v517_v55 = vsel %vm282_vm1, %v387_v28, %v515_v54 }
 0x58e   : > { %v518_v56 = vpack.c.bf16 %v517_v55, %v517_v55 }
 0x590   : > { %519 = vst [vmem:[%s275_s5] sm:$0xf] %v518_v56 }
 0x591 PF: > { %s13_s14 = sadd.s32 1, %s750_s14   ;;  %s850_s12 = smov %s746_s13 }
 0x592   : > { %p10_p5 = scmp.ge.s32.totalorder %s13_s14, 4   ;;  %s851_s13 = smov %s853_s15 }
 0x594   :  { %12 = sbr.rel (!%p10_p5) target bundleno = 2 (0x2), region = 68 }

// kernel: visual_encoder_forward.17
= control target key start
LH: loop header
LB: loop body
LE: loop exit
PB: predicated region body
PF: predicated region fallthrough
CT: control target
= control target key end

     0   :  { %v198_v0 = vmov 0.0   ;;  %vm199_vm0 = vmmov 0   ;;  %s267_s1 = inlined_call_operand.vmem [shape: bf16[128,128], index: 1, kind: input, shape index: {}]   ;;  %s268_s0 = inlined_call_operand.vmem [shape: bf16[16,128], index: 0, kind: input, shape index: {}]   ;;  %s269_s2 = inlined_call_operand.vmem [shape: f32[1,128], index: 2, kind: input, shape index: {}]   ;;  %s270_s3 = inlined_call_operand.vmem [shape: f32[16,128], index: 3, kind: input, shape index: {}, may-alias: {3,4}]   ;;  %s271_s4 = inlined_call_operand.vmem [shape: f32[16,128], index: 4, kind: output, shape index: {}, may-alias: {3,4}]  }
   0x1   :  { %167 = vmatprep.subr.bf16.mxu0 %v198_v0  ;;  %v189_v1 = vld [vmem:[%s267_s1] sm:$0xff]   ;;  %183 = vmatprep.mubr.msk.bf16.mxu0 %vm199_vm0, %v198_v0  ;;  %v190_v2 = vld [vmem:[%s267_s1 + $0x8] sm:$0xff]   ;;  %v191_v3 = vld [vmem:[%s267_s1 + $0x10] sm:$0xff]  }
   0x2   :  { %168 = vmatpush3.bf16.msra.mxu0 %v189_v1  ;;  %v192_v4 = vld [vmem:[%s267_s1 + $0x18] sm:$0xff]   ;;  %v193_v5 = vld [vmem:[%s267_s1 + $0x20] sm:$0xff]   ;;  %v194_v6 = vld [vmem:[%s267_s1 + $0x28] sm:$0xff]  }
   0x3   :  { %169 = vmatprep.subr.bf16.mxu0 %v198_v0  ;;  %v195_v7 = vld [vmem:[%s267_s1 + $0x30] sm:$0xff]   ;;  %v196_v8 = vld [vmem:[%s267_s1 + $0x38] sm:$0xff]   ;;  %v197_v9 = vld [vmem:[%s268_s0] sm:$0xff]  }
   0x4   :  { %v148_v10 = vld [vmem:[%s269_s2] ss:$0 sm:$0xff]  ;;  %v139_v16 = vld [vmem:[%s270_s3 + $0x8] sm:$0xff] }
   0x5   :  { %v138_v12 = vld [vmem:[%s270_s3] sm:$0xff] }
   0x6   :  { %170 = vmatpush3.bf16.msra.mxu0 %v190_v2 }
   0x7   :  { %171 = vmatprep.subr.bf16.mxu0 %v198_v0 }
   0xa   :  { %172 = vmatpush3.bf16.msra.mxu0 %v191_v3 }
   0xb   :  { %173 = vmatprep.subr.bf16.mxu0 %v198_v0 }
   0xe   :  { %174 = vmatpush3.bf16.msra.mxu0 %v192_v4 }
   0xf   :  { %175 = vmatprep.subr.bf16.mxu0 %v198_v0 }
  0x12   :  { %176 = vmatpush3.bf16.msra.mxu0 %v193_v5 }
  0x13   :  { %177 = vmatprep.subr.bf16.mxu0 %v198_v0 }
  0x16   :  { %178 = vmatpush3.bf16.msra.mxu0 %v194_v6 }
  0x17   :  { %179 = vmatprep.subr.bf16.mxu0 %v198_v0 }
  0x1a   :  { %180 = vmatpush3.bf16.msra.mxu0 %v195_v7 }
  0x1b   :  { %181 = vmatprep.subr.bf16.mxu0 %v198_v0 }
  0x1e   :  { %182 = vmatpush3.bf16.msra.mxu0 %v196_v8 }
  0x21   :  { %184 = vmatmul.mubr.bf16.vlgmr.msra.gmra.mrb[0].mxu0 %v197_v9 }
  0xf4   :  { %v131_v11 = vpop.f32.mrb[0].mxu0 }
  0xf5   :  { %v132_v13 = vadd.f32 %v148_v10, %v131_v11  ;;  %v185_v14 = vpop.f32.mrb[1].mxu0 }
  0xf6   :  { %v134_v15 = vpop.f32.mrb[2].mxu0 }
  0xf7   :  { %v140_v17 = vadd.f32 %v138_v12, %v132_v13  ;;  %v135_v18 = vadd.f32 %v148_v10, %v134_v15  ;;  %v186_v19 = vpop.f32.mrb[3].mxu0 }
  0xf9   :  { %142 = vst [vmem:[%s271_s4] sm:$0xff] %v140_v17  ;;  %v141_v20 = vadd.f32 %v139_v16, %v135_v18 }
  0xfb   :  { %143 = vst [vmem:[%s271_s4 + $0x8] sm:$0xff] %v141_v20 }

// kernel: visual_encoder_forward.19
= control target key start
LH: loop header
LB: loop body
LE: loop exit
PB: predicated region body
PF: predicated region fallthrough
CT: control target
= control target key end

     0   :  { %s664_s1 = inlined_call_operand.vmem [shape: bf16[512,128], index: 1, kind: input, shape index: {}]   ;;  %s665_s0 = inlined_call_operand.vmem [shape: bf16[16,512], index: 0, kind: input, shape index: {}]   ;;  %s666_s2 = inlined_call_operand.vmem [shape: f32[1,128], index: 2, kind: input, shape index: {}]   ;;  %s667_s3 = inlined_call_operand.vmem [shape: f32[16,128], index: 3, kind: input, shape index: {}, may-alias: {3,4}]   ;;  %s668_s4 = inlined_call_operand.vmem [shape: f32[16,128], index: 4, kind: output, shape index: {}, may-alias: {3,4}]  }
   0x1   :  { %v478_v0 = vld [vmem:[%s664_s1 + $0x40] sm:$0xff]   ;;  %v482_v4 = vld [vmem:[%s664_s1 + $0x48] sm:$0xff]   ;;  %v486_v8 = vld [vmem:[%s664_s1 + $0x50] sm:$0xff]  }
   0x2   :  { %v479_v1 = vld [vmem:[%s664_s1 + $0xc0] sm:$0xff]   ;;  %434 = vmatprep.subr.bf16.mxu0 %v478_v0  ;;  %v483_v5 = vld [vmem:[%s664_s1 + $0xc8] sm:$0xff]   ;;  %v487_v9 = vld [vmem:[%s664_s1 + $0xd0] sm:$0xff]  }
   0x3   :  { %v480_v2 = vld [vmem:[%s664_s1] sm:$0xff]   ;;  %456 = vmatprep.subr.bf16.mxu1 %v479_v1  ;;  %v484_v6 = vld [vmem:[%s664_s1 + $0x8] sm:$0xff]   ;;  %v488_v10 = vld [vmem:[%s664_s1 + $0x10] sm:$0xff]  }
   0x4   :  { %v481_v3 = vld [vmem:[%s664_s1 + $0x80] sm:$0xff]   ;;  %435 = vmatpush3.bf16.msra.mxu0 %v480_v2  ;;  %v485_v7 = vld [vmem:[%s664_s1 + $0x88] sm:$0xff]   ;;  %v489_v11 = vld [vmem:[%s664_s1 + $0x90] sm:$0xff]  }
   0x5   :  { %457 = vmatpush3.bf16.msra.mxu1 %v481_v3  ;;  %436 = vmatprep.subr.bf16.mxu0 %v482_v4  ;;  %v490_v12 = vld [vmem:[%s664_s1 + $0x58] sm:$0xff]   ;;  %v494_v16 = vld [vmem:[%s664_s1 + $0x60] sm:$0xff]   ;;  %v498_v20 = vld [vmem:[%s664_s1 + $0x68] sm:$0xff]  }
   0x6   :  { %458 = vmatprep.subr.bf16.mxu1 %v483_v5  ;;  %v491_v13 = vld [vmem:[%s664_s1 + $0xd8] sm:$0xff]   ;;  %v495_v17 = vld [vmem:[%s664_s1 + $0xe0] sm:$0xff]   ;;  %v499_v21 = vld [vmem:[%s664_s1 + $0xe8] sm:$0xff]  }
   0x7   :  { %v492_v14 = vld [vmem:[%s664_s1 + $0x18] sm:$0xff]   ;;  %v496_v18 = vld [vmem:[%s664_s1 + $0x20] sm:$0xff]   ;;  %v500_v22 = vld [vmem:[%s664_s1 + $0x28] sm:$0xff]  }
   0x8   :  { %437 = vmatpush3.bf16.msra.mxu0 %v484_v6  ;;  %v493_v15 = vld [vmem:[%s664_s1 + $0x98] sm:$0xff]   ;;  %v497_v19 = vld [vmem:[%s664_s1 + $0xa0] sm:$0xff]   ;;  %v501_v23 = vld [vmem:[%s664_s1 + $0xa8] sm:$0xff]  }
   0x9   :  { %459 = vmatpush3.bf16.msra.mxu1 %v485_v7  ;;  %438 = vmatprep.subr.bf16.mxu0 %v486_v8  ;;  %v502_v24 = vld [vmem:[%s664_s1 + $0x70] sm:$0xff]   ;;  %v506_v28 = vld [vmem:[%s664_s1 + $0x78] sm:$0xff]   ;;  %v397_v38 = vld [vmem:[%s666_s2] ss:$0 sm:$0xff] }
   0xa   :  { %460 = vmatprep.subr.bf16.mxu1 %v487_v9  ;;  %v503_v25 = vld [vmem:[%s664_s1 + $0xf0] sm:$0xff]   ;;  %v507_v29 = vld [vmem:[%s664_s1 + $0xf8] sm:$0xff]   ;;  %v387_v49 = vld [vmem:[%s667_s3] sm:$0xff] }
   0xb   :  { %v504_v26 = vld [vmem:[%s664_s1 + $0x30] sm:$0xff]   ;;  %v508_v30 = vld [vmem:[%s664_s1 + $0x38] sm:$0xff]   ;;  %v388_v53 = vld [vmem:[%s667_s3 + $0x8] sm:$0xff] }
   0xc   :  { %439 = vmatpush3.bf16.msra.mxu0 %v488_v10  ;;  %v505_v27 = vld [vmem:[%s664_s1 + $0xb0] sm:$0xff]   ;;  %v509_v31 = vld [vmem:[%s664_s1 + $0xb8] sm:$0xff]  }
   0xd   :  { %461 = vmatpush3.bf16.msra.mxu1 %v489_v11  ;;  %440 = vmatprep.subr.bf16.mxu0 %v490_v12  ;;  %v510_v32 = vld [vmem:[%s665_s0] ss:$16 sps:$4 sm:$0xff]   ;;  %v512_v33 = vld [vmem:[%s665_s0 + $0x4] ss:$16 sps:$4 sm:$0xff]   ;;  %v513_v34 = vld [vmem:[%s665_s0 + $0x8] ss:$16 sps:$4 sm:$0xff]  }
   0xe   :  { %462 = vmatprep.subr.bf16.mxu1 %v491_v13  ;;  %v515_v35 = vld [vmem:[%s665_s0 + $0xc] ss:$16 sps:$4 sm:$0xff]   ;;  %337 = vmatprep.mubr.bf16.mxu0 %v512_v33 }
   0xf   :  { %378 = vmatprep.mubr.bf16.mxu1 %v515_v35 }
  0x10   :  { %441 = vmatpush3.bf16.msra.mxu0 %v492_v14 }
  0x11   :  { %463 = vmatpush3.bf16.msra.mxu1 %v493_v15  ;;  %442 = vmatprep.subr.bf16.mxu0 %v494_v16 }
  0x12   :  { %464 = vmatprep.subr.bf16.mxu1 %v495_v17 }
  0x14   :  { %443 = vmatpush3.bf16.msra.mxu0 %v496_v18 }
  0x15   :  { %465 = vmatpush3.bf16.msra.mxu1 %v497_v19  ;;  %444 = vmatprep.subr.bf16.mxu0 %v498_v20 }
  0x16   :  { %466 = vmatprep.subr.bf16.mxu1 %v499_v21 }
  0x18   :  { %445 = vmatpush3.bf16.msra.mxu0 %v500_v22 }
  0x19   :  { %467 = vmatpush3.bf16.msra.mxu1 %v501_v23  ;;  %446 = vmatprep.subr.bf16.mxu0 %v502_v24 }
  0x1a   :  { %468 = vmatprep.subr.bf16.mxu1 %v503_v25 }
  0x1c   :  { %447 = vmatpush3.bf16.msra.mxu0 %v504_v26 }
  0x1d   :  { %469 = vmatpush3.bf16.msra.mxu1 %v505_v27  ;;  %448 = vmatprep.subr.bf16.mxu0 %v506_v28 }
  0x1e   :  { %470 = vmatprep.subr.bf16.mxu1 %v507_v29 }
  0x20   :  { %449 = vmatpush3.bf16.msra.mxu0 %v508_v30 }
  0x21   :  { %471 = vmatpush3.bf16.msra.mxu1 %v509_v31 }
  0x23   :  { %338 = vmatmul.mubr.bf16.vlgmr.msra.gmra.mrb[0].mxu0 %v510_v32 }
  0x24   :  { %379 = vmatmul.mubr.bf16.vlgmr.msra.gmra.mrb[0].mxu1 %v513_v34 }
  0xf6   :  { %v450_v36 = vpop.f32.mrb[0].mxu0 }
  0xf7   :  { %v472_v37 = vpop.f32.mrb[0].mxu1  ;;  %v451_v39 = vpop.f32.mrb[1].mxu0 }
  0xf8   :  { %v452_v40 = vadd.f32 %v451_v39, %v450_v36  ;;  %v473_v41 = vpop.f32.mrb[1].mxu1  ;;  %v453_v42 = vpop.f32.mrb[2].mxu0 }
  0xf9   :  { %v474_v43 = vadd.f32 %v473_v41, %v472_v37  ;;  %v475_v44 = vpop.f32.mrb[2].mxu1  ;;  %v454_v45 = vpop.f32.mrb[3].mxu0 }
  0xfa   :  { %v340_v46 = vadd.f32 %v452_v40, %v397_v38  ;;  %v455_v47 = vadd.f32 %v454_v45, %v453_v42  ;;  %v476_v48 = vpop.f32.mrb[3].mxu1 }
  0xfb   :  { %v477_v50 = vadd.f32 %v476_v48, %v475_v44 }
  0xfc   :  { %v381_v51 = vadd.f32 %v474_v43, %v340_v46  ;;  %v343_v52 = vadd.f32 %v455_v47, %v397_v38 }
  0xfe   :  { %v389_v54 = vadd.f32 %v387_v49, %v381_v51  ;;  %v384_v55 = vadd.f32 %v477_v50, %v343_v52 }
 0x100   :  { %391 = vst [vmem:[%s668_s4] sm:$0xff] %v389_v54  ;;  %v390_v56 = vadd.f32 %v388_v53, %v384_v55 }
 0x102   :  { %392 = vst [vmem:[%s668_s4 + $0x8] sm:$0xff] %v390_v56 }

// kernel: visual_encoder_forward.25
= control target key start
LH: loop header
LB: loop body
LE: loop exit
PB: predicated region body
PF: predicated region fallthrough
CT: control target
= control target key end

     0   :  { %vm22_vm0 = vcmask 1041408   ;;  %s331_s0 = inlined_call_operand.vmem [shape: f32[2,128], index: 0, kind: input, shape index: {}]   ;;  %s332_s1 = inlined_call_operand.vmem [shape: f32[1,128], index: 1, kind: input, shape index: {}]   ;;  %s333_s2 = inlined_call_operand.vmem [shape: f32[1,128], index: 2, kind: input, shape index: {}]   ;;  %s334_s3 = inlined_call_operand.vmem [shape: bf16[128,128], index: 3, kind: input, shape index: {}]   ;;  %s335_s4 = inlined_call_operand.hbm [shape: f32[2,128], index: 4, kind: output, shape index: {}]  }
   0x1   :  { %v19_v0 = vld [vmem:[%s331_s0] sm:$0x3] }
   0x2   :  { %v23_v1 = vsel %vm22_vm0, %v19_v0, 0.0 }
   0x3   :  { %24 = vadd.xlane.f32.xlu0 %v23_v1 }
   0x4   :  { %9 = vsyncpa [#allocation3], 0  ;;  %v219_v2 = vld [vmem:[%s334_s3] sm:$0xff]   ;;  %v255_v3 = vmov 0.0   ;;  %v220_v4 = vld [vmem:[%s334_s3 + $0x8] sm:$0xff]   ;;  %vm256_vm1 = vmmov 0  }
   0x5   :  { %196 = vmatprep.subr.bf16.mxu0 %v255_v3  ;;  %v221_v10 = vld [vmem:[%s334_s3 + $0x10] sm:$0xff]   ;;  %v222_v11 = vld [vmem:[%s334_s3 + $0x18] sm:$0xff]   ;;  %v223_v12 = vld [vmem:[%s334_s3 + $0x20] sm:$0xff]   ;;  %212 = vmatprep.mubr.msk.bf16.mxu0 %vm256_vm1, %v255_v3 }
   0x6   :  { %197 = vmatpush3.bf16.msra.mxu0 %v219_v2  ;;  %v224_v13 = vld [vmem:[%s334_s3 + $0x28] sm:$0xff]   ;;  %v225_v14 = vld [vmem:[%s334_s3 + $0x30] sm:$0xff]   ;;  %v226_v15 = vld [vmem:[%s334_s3 + $0x38] sm:$0xff]  }
   0x7   :  { %198 = vmatprep.subr.bf16.mxu0 %v255_v3  ;;  %v177_v20 = vld [vmem:[%s332_s1] ss:$0 sm:$0xff]  ;;  %s257_s1 = smov [#allocation2]  }
   0x8   :  { %v178_v22 = vld [vmem:[%s333_s2] ss:$0 sm:$0xff]  ;;  %s169_s3 = sshll.u32 %s257_s1, 4  ;;  %s170_s3 = int_to_ptr.vmem [resolvable:$true] %s169_s3 }
   0x9   :  { %s231_s2 = scalar_lea.vmem %s170_s3, 32  ;;  %p236_p1 = scmp.lt.s32.totalorder %s170_s3, %s170_s3 }
   0xa   :  { %199 = vmatpush3.bf16.msra.mxu0 %v220_v4  ;;  %p232_p0 = scmp.ne.s32.totalorder %s170_s3, %s231_s2  ;;  %p237_p2 = scmp.lt.s32.totalorder %s231_s2, %s231_s2 }
   0xb   :  { %200 = vmatprep.subr.bf16.mxu0 %v255_v3 }
   0xc   :  { %p238_p3 = por %p237_p2, %p236_p1 }
   0xe   :  { %201 = vmatpush3.bf16.msra.mxu0 %v221_v10  ;;  %p239_p4 = pnand %p238_p3, %p232_p0 }
   0xf   :  { %202 = vmatprep.subr.bf16.mxu0 %v255_v3 }
  0x12   :  { %203 = vmatpush3.bf16.msra.mxu0 %v222_v11 }
  0x13   :  { %204 = vmatprep.subr.bf16.mxu0 %v255_v3 }
  0x16   :  { %205 = vmatpush3.bf16.msra.mxu0 %v223_v12 }
  0x17   :  { %206 = vmatprep.subr.bf16.mxu0 %v255_v3 }
  0x1a   :  { %207 = vmatpush3.bf16.msra.mxu0 %v224_v13 }
  0x1b   :  { %208 = vmatprep.subr.bf16.mxu0 %v255_v3 }
  0x1e   :  { %209 = vmatpush3.bf16.msra.mxu0 %v225_v14 }
  0x1f   :  { %210 = vmatprep.subr.bf16.mxu0 %v255_v3 }
  0x22   :  { %211 = vmatpush3.bf16.msra.mxu0 %v226_v15 }
  0x90   :  { %v25_v5 = vpop.xlane.xlu0 %24 }
  0x91   :  { %v27_v6 = vmul.f32 0.0078125, %v25_v5 }
  0x93   :  { %v28_v7 = vsub.f32 %v19_v0, %v27_v6 }
  0x95   :  { %v29_v8 = vmul.f32 %v28_v7, %v28_v7 }
  0x97   :  { %v30_v9 = vsel %vm22_vm0, %v29_v8, 0.0 }
  0x98   :  { %31 = vadd.xlane.f32.xlu0 %v30_v9 }
 0x125   :  { %v32_v16 = vpop.xlane.xlu0 %31 }
 0x126   :  { %v33_v17 = vmul.f32 0.0078125, %v32_v16 }
 0x128   :  { %v34_v18 = vadd.f32 1e-05, %v33_v17 }
 0x12a   :  { %227 = vrsqrt.f32 %v34_v18 }
 0x134   :  { %v228_v19 = vpop.eup %227 }
 0x135   :  { %v36_v21 = vmul.f32 %v228_v19, %v28_v7 }
 0x137   :  { %v43_v23 = vmul.f32 %v177_v20, %v36_v21 }
 0x139   :  { %v50_v24 = vadd.f32 %v178_v22, %v43_v23 }
 0x13b   :  { %v51_v25 = vpack.c.bf16 %v50_v24, %v50_v24 }
 0x13d   :  { %213 = vmatmul.mubr.bf16.vlgmr.msra.gmra.mrb[0].mxu0 %v51_v25 }
 0x210   :  { %v150_v26 = vpop.f32.mrb[0].mxu0 }
 0x211   :  { %v214_v27 = vpop.f32.mrb[1].mxu0  ;;  %v156_v28 = vmul.f32 %v150_v26, %v150_v26 }
 0x212   :  { %v153_v29 = vpop.f32.mrb[2].mxu0 }
 0x213   :  { %v215_v30 = vpop.f32.mrb[3].mxu0  ;;  %v157_v31 = vsel %vm22_vm0, %v156_v28, 0.0 }
 0x214   :  { %158 = vadd.xlane.f32.xlu1 %v157_v31 }
 0x2a1   :  { %v159_v32 = vpop.xlane.xlu1 %158 }
 0x2a2   :  { %229 = vrsqrt.f32 %v159_v32 }
 0x2ac   :  { %v230_v33 = vpop.eup %229 }
 0x2ad   :  { %v161_v34 = vmul.f32 %v230_v33, %v150_v26 }
 0x2af   :  { %162 = vst [vmem:[#allocation2] sm:$0x3] %v161_v34 }
 0x2b0   :  { %242 = shalt.err (!%p239_p4)
}
 0x2b1   :  { %s243_s12 = scalar_lea.hbm %s335_s4, 32 }
 0x2b2   :  { %p244_p5 = scmp.ne.s32.totalorder %s335_s4, %s243_s12  ;;  %p247_p6 = scmp.lt.u32.totalorder %s243_s12, %s335_s4 }
 0x2b4   :  { %p249_p7 = pnand %p247_p6, %p244_p5 }
 0x2b6   :  { %252 = shalt.err (!%p249_p7)
}
 0x2b7   :  { %172 = dma.vmem_to_hbm [thread:$0]  %s170_s3, 32, %s335_s4, [#allocation3]  }
 0x2b8   :  { %253 = dma.done.wait [#allocation3], 32  }
 0x2b9   :  { %254 = vsyncadd [#allocation3], 4294967264 }
 0x2ba   :  { %176 = vsyncpa [#allocation3], 1 }

// kernel: visual_encoder_forward.18
= control target key start
LH: loop header
LB: loop body
LE: loop exit
PB: predicated region body
PF: predicated region fallthrough
CT: control target
= control target key end

     0   :  { %v596_v36 = vmov 0   ;;  %v99_v60 = vlaneseq  ;;  %s792_s0 = inlined_call_operand.vmem [shape: f32[16,128], index: 0, kind: input, shape index: {}]   ;;  %s793_s3 = inlined_call_operand.vmem [shape: bf16[128,512], index: 3, kind: input, shape index: {}]   ;;  %s794_s1 = inlined_call_operand.vmem [shape: f32[1,128], index: 1, kind: input, shape index: {}]   ;;  %s795_s2 = inlined_call_operand.vmem [shape: f32[1,128], index: 2, kind: input, shape index: {}]   ;;  %s796_s4 = inlined_call_operand.vmem [shape: f32[1,512], index: 4, kind: input, shape index: {}]   ;;  %s797_s5 = inlined_call_operand.vmem [shape: bf16[16,512], index: 5, kind: output, shape index: {}]  }
   0x1   :  { %v21_v0 = vld [vmem:[%s792_s0] sm:$0xff]  ;;  %v22_v1 = vld [vmem:[%s792_s0 + $0x8] sm:$0xff]  ;;  %311 = vmatprep.mubr.bf16.mxu0 %v596_v36  ;;  %354 = vmatprep.mubr.bf16.mxu1 %v596_v36 }
   0x2   :  { %25 = vadd.xlane.f32.xlu0 %v21_v0  ;;  %v512_v2 = vld [vmem:[%s793_s3 + $0x4] ss:$16 sps:$4 sm:$0xff]   ;;  %v514_v3 = vld [vmem:[%s793_s3 + $0xc] ss:$16 sps:$4 sm:$0xff]   ;;  %v516_v4 = vld [vmem:[%s793_s3] ss:$16 sps:$4 sm:$0xff]  }
   0x3   :  { %279 = vmatprep.subr.bf16.mxu0 %v512_v2  ;;  %v517_v5 = vld [vmem:[%s793_s3 + $0x8] ss:$16 sps:$4 sm:$0xff]   ;;  %322 = vmatprep.subr.bf16.mxu1 %v514_v3  ;;  %v518_v6 = vld [vmem:[%s793_s3 + $0x24] ss:$16 sps:$4 sm:$0xff]   ;;  %v520_v7 = vld [vmem:[%s793_s3 + $0x2c] ss:$16 sps:$4 sm:$0xff]  }
   0x4   :  { %280 = vmatpush1.bf16.msra.mxu0 %v516_v4  ;;  %323 = vmatpush1.bf16.msra.mxu1 %v517_v5  ;;  %v522_v16 = vld [vmem:[%s793_s3 + $0x20] ss:$16 sps:$4 sm:$0xff]   ;;  %v523_v17 = vld [vmem:[%s793_s3 + $0x28] ss:$16 sps:$4 sm:$0xff]   ;;  %v524_v18 = vld [vmem:[%s793_s3 + $0x44] ss:$16 sps:$4 sm:$0xff]  }
   0x5   :  { %281 = vmatprep.subr.bf16.mxu0 %v518_v6  ;;  %324 = vmatprep.subr.bf16.mxu1 %v520_v7  ;;  %v526_v19 = vld [vmem:[%s793_s3 + $0x4c] ss:$16 sps:$4 sm:$0xff]   ;;  %v528_v20 = vld [vmem:[%s793_s3 + $0x40] ss:$16 sps:$4 sm:$0xff]   ;;  %v529_v21 = vld [vmem:[%s793_s3 + $0x48] ss:$16 sps:$4 sm:$0xff]  }
   0x6   :  { %27 = vadd.xlane.f32.xlu0 %v22_v1  ;;  %v530_v22 = vld [vmem:[%s793_s3 + $0x64] ss:$16 sps:$4 sm:$0xff]   ;;  %v532_v23 = vld [vmem:[%s793_s3 + $0x6c] ss:$16 sps:$4 sm:$0xff]   ;;  %v534_v24 = vld [vmem:[%s793_s3 + $0x60] ss:$16 sps:$4 sm:$0xff]  }
   0x7   :  { %v535_v25 = vld [vmem:[%s793_s3 + $0x68] ss:$16 sps:$4 sm:$0xff]   ;;  %v536_v26 = vld [vmem:[%s793_s3 + $0x84] ss:$16 sps:$4 sm:$0xff]   ;;  %v538_v27 = vld [vmem:[%s793_s3 + $0x8c] ss:$16 sps:$4 sm:$0xff]  }
   0x8   :  { %282 = vmatpush1.bf16.msra.mxu0 %v522_v16  ;;  %325 = vmatpush1.bf16.msra.mxu1 %v523_v17  ;;  %v540_v28 = vld [vmem:[%s793_s3 + $0x80] ss:$16 sps:$4 sm:$0xff]   ;;  %v541_v29 = vld [vmem:[%s793_s3 + $0x88] ss:$16 sps:$4 sm:$0xff]   ;;  %v542_v30 = vld [vmem:[%s793_s3 + $0xa4] ss:$16 sps:$4 sm:$0xff]  }
   0x9   :  { %283 = vmatprep.subr.bf16.mxu0 %v524_v18  ;;  %326 = vmatprep.subr.bf16.mxu1 %v526_v19  ;;  %v544_v31 = vld [vmem:[%s793_s3 + $0xac] ss:$16 sps:$4 sm:$0xff]   ;;  %v546_v32 = vld [vmem:[%s793_s3 + $0xa0] ss:$16 sps:$4 sm:$0xff]   ;;  %v547_v33 = vld [vmem:[%s793_s3 + $0xa8] ss:$16 sps:$4 sm:$0xff]  }
   0xa   :  { %v548_v34 = vld [vmem:[%s793_s3 + $0xc4] ss:$16 sps:$4 sm:$0xff]   ;;  %v550_v35 = vld [vmem:[%s793_s3 + $0xcc] ss:$16 sps:$4 sm:$0xff]   ;;  %v552_v37 = vld [vmem:[%s793_s3 + $0xc0] ss:$16 sps:$4 sm:$0xff]  }
   0xb   :  { %v553_v38 = vld [vmem:[%s793_s3 + $0xc8] ss:$16 sps:$4 sm:$0xff]   ;;  %v554_v39 = vld [vmem:[%s793_s3 + $0xe4] ss:$16 sps:$4 sm:$0xff]   ;;  %v556_v40 = vld [vmem:[%s793_s3 + $0xec] ss:$16 sps:$4 sm:$0xff]  }
   0xc   :  { %284 = vmatpush1.bf16.msra.mxu0 %v528_v20  ;;  %327 = vmatpush1.bf16.msra.mxu1 %v529_v21  ;;  %v558_v41 = vld [vmem:[%s793_s3 + $0xe0] ss:$16 sps:$4 sm:$0xff]   ;;  %v559_v42 = vld [vmem:[%s793_s3 + $0xe8] ss:$16 sps:$4 sm:$0xff]   ;;  %v100_v61 = vshrl.u32 %v99_v60, 7 }
   0xd   :  { %285 = vmatprep.subr.bf16.mxu0 %v530_v22  ;;  %328 = vmatprep.subr.bf16.mxu1 %v532_v23  ;;  %v461_v51 = vld [vmem:[%s794_s1] ss:$0 sm:$0xff] }
   0xe   :  { %v462_v55 = vld [vmem:[%s795_s2] ss:$0 sm:$0xff]  ;;  %v101_v62 = vsub.s32 0, %v100_v61  ;;  %v109_v63 = vsub.s32 2, %v100_v61  ;;  %v113_v2 = vsub.s32 3, %v100_v61 }
  0x10   :  { %286 = vmatpush1.bf16.msra.mxu0 %v534_v24  ;;  %329 = vmatpush1.bf16.msra.mxu1 %v535_v25 }
  0x11   :  { %287 = vmatprep.subr.bf16.mxu0 %v536_v26  ;;  %330 = vmatprep.subr.bf16.mxu1 %v538_v27 }
  0x14   :  { %288 = vmatpush1.bf16.msra.mxu0 %v540_v28  ;;  %331 = vmatpush1.bf16.msra.mxu1 %v541_v29 }
  0x15   :  { %289 = vmatprep.subr.bf16.mxu0 %v542_v30  ;;  %332 = vmatprep.subr.bf16.mxu1 %v544_v31 }
  0x18   :  { %290 = vmatpush1.bf16.msra.mxu0 %v546_v32  ;;  %333 = vmatpush1.bf16.msra.mxu1 %v547_v33 }
  0x19   :  { %291 = vmatprep.subr.bf16.mxu0 %v548_v34  ;;  %334 = vmatprep.subr.bf16.mxu1 %v550_v35 }
  0x1c   :  { %292 = vmatpush1.bf16.msra.mxu0 %v552_v37  ;;  %335 = vmatpush1.bf16.msra.mxu1 %v553_v38 }
  0x1d   :  { %293 = vmatprep.subr.bf16.mxu0 %v554_v39  ;;  %336 = vmatprep.subr.bf16.mxu1 %v556_v40 }
  0x20   :  { %294 = vmatpush1.bf16.msra.mxu0 %v558_v41  ;;  %337 = vmatpush1.bf16.msra.mxu1 %v559_v42 }
  0x8f   :  { %v26_v8 = vpop.xlane.xlu0 %25 }
  0x90   :  { %v30_v9 = vmul.f32 0.0078125, %v26_v8 }
  0x92   :  { %v651_v10 = vsub.f32 %v21_v0, %v30_v9  ;;  %v97_v0 = vld [vmem:[%s796_s4] sm:$0xf] }
  0x93   :  { %v28_v11 = vpop.xlane.xlu0 %27  ;;  %v102_v3 = vrot.slane %v97_v0, %v101_v62  ;;  %v110_v4 = vrot.slane %v97_v0, %v109_v63  ;;  %v114_v6 = vrot.slane %v97_v0, %v113_v2 }
  0x94   :  { %v31_v12 = vmul.f32 0.0078125, %v28_v11  ;;  %v34_v13 = vmul.f32 %v651_v10, %v651_v10 }
  0x96   :  { %v655_v14 = vsub.f32 %v22_v1, %v31_v12  ;;  %36 = vadd.xlane.f32.xlu1 %v34_v13  ;;  %v105_v1 = vsub.s32 1, %v100_v61 }
  0x98   :  { %v35_v15 = vmul.f32 %v655_v14, %v655_v14  ;;  %v106_v5 = vrot.slane %v97_v0, %v105_v1 }
  0x9a   :  { %38 = vadd.xlane.f32.xlu1 %v35_v15 }
 0x123   :  { %v37_v43 = vpop.xlane.xlu1 %36 }
 0x124   :  { %v40_v44 = vmul.f32 0.0078125, %v37_v43 }
 0x126   :  { %v42_v45 = vadd.f32 1e-05, %v40_v44 }
 0x127   :  { %v39_v46 = vpop.xlane.xlu1 %38 }
 0x128   :  { %560 = vrsqrt.f32 %v42_v45  ;;  %v41_v47 = vmul.f32 0.0078125, %v39_v46 }
 0x12a   :  { %v43_v48 = vadd.f32 1e-05, %v41_v47 }
 0x12c   :  { %562 = vrsqrt.f32 %v43_v48 }
 0x132   :  { %v561_v49 = vpop.eup %560 }
 0x133   :  { %v46_v50 = vmul.f32 %v561_v49, %v651_v10 }
 0x135   :  { %v54_v54 = vmul.f32 %v461_v51, %v46_v50 }
 0x136   :  { %v563_v52 = vpop.eup %562 }
 0x137   :  { %v47_v53 = vmul.f32 %v563_v52, %v655_v14  ;;  %v62_v57 = vadd.f32 %v462_v55, %v54_v54 }
 0x139   :  { %v55_v56 = vmul.f32 %v461_v51, %v47_v53 }
 0x13b   :  { %v63_v58 = vadd.f32 %v462_v55, %v55_v56 }
 0x13d   :  { %v64_v59 = vpack.c.bf16 %v63_v58, %v62_v57 }
 0x13f   :  { %312 = vmatmul.mubr.bf16.vlgmr.msra.gmra.mrb[0].mxu0 %v64_v59  ;;  %355 = vmatmul.mubr.bf16.vlgmr.msra.gmra.mrb[0].mxu1 %v64_v59 }
 0x212   :  { %v313_v7 = vpop.f32.mrb[0].mxu0  ;;  %v356_v8 = vpop.f32.mrb[0].mxu1 }
 0x213   :  { %v748_v9 = vadd.f32 %v313_v7, %v102_v3  ;;  %v750_v10 = vadd.f32 %v356_v8, %v110_v4  ;;  %v315_v11 = vpop.f32.mrb[1].mxu0  ;;  %v358_v12 = vpop.f32.mrb[1].mxu1 }
 0x214   :  { %v752_v13 = vadd.f32 %v315_v11, %v106_v5  ;;  %v754_v14 = vadd.f32 %v358_v12, %v114_v6  ;;  %v317_v15 = vpop.f32.mrb[2].mxu0  ;;  %v360_v16 = vpop.f32.mrb[2].mxu1 }
 0x215   :  { %v495_v17 = vmul.f32 -1.702, %v748_v9  ;;  %v497_v18 = vmul.f32 -1.702, %v750_v10  ;;  %v758_v19 = vadd.f32 %v317_v15, %v102_v3  ;;  %v760_v20 = vadd.f32 %v360_v16, %v110_v4  ;;  %v319_v21 = vpop.f32.mrb[3].mxu0  ;;  %v362_v22 = vpop.f32.mrb[3].mxu1 }
 0x216   :  { %v496_v23 = vmul.f32 -1.702, %v752_v13  ;;  %v498_v24 = vmul.f32 -1.702, %v754_v14  ;;  %v764_v25 = vadd.f32 %v319_v21, %v106_v5  ;;  %v766_v26 = vadd.f32 %v362_v22, %v114_v6 }
 0x217   :  { %v381_v27 = vmul.f32 1.442695, %v495_v17  ;;  %v385_v28 = vmul.f32 1.442695, %v497_v18  ;;  %v499_v29 = vmul.f32 -1.702, %v758_v19 }
 0x218   :  { %v383_v30 = vmul.f32 1.442695, %v496_v23  ;;  %v387_v31 = vmul.f32 1.442695, %v498_v24  ;;  %v501_v32 = vmul.f32 -1.702, %v760_v20 }
 0x219   :  { %564 = vpow2.f32 %v381_v27  ;;  %v389_v33 = vmul.f32 1.442695, %v499_v29  ;;  %v500_v34 = vmul.f32 -1.702, %v764_v25  ;;  %v502_v35 = vmul.f32 -1.702, %v766_v26 }
 0x21a   :  { %566 = vpow2.f32 %v385_v28  ;;  %v393_v36 = vmul.f32 1.442695, %v501_v32 }
 0x21b   :  { %568 = vpow2.f32 %v383_v30  ;;  %v391_v37 = vmul.f32 1.442695, %v500_v34  ;;  %v395_v38 = vmul.f32 1.442695, %v502_v35 }
 0x21c   :  { %570 = vpow2.f32 %v387_v31 }
 0x21d   :  { %572 = vpow2.f32 %v389_v33 }
 0x21e   :  { %574 = vpow2.f32 %v393_v36 }
 0x21f   :  { %576 = vpow2.f32 %v391_v37 }
 0x220   :  { %578 = vpow2.f32 %v395_v38 }
 0x223   :  { %v565_v39 = vpop.eup %564 }
 0x224   :  { %v567_v40 = vpop.eup %566  ;;  %v397_v41 = vadd.f32 1.0, %v565_v39 }
 0x225   :  { %v569_v42 = vpop.eup %568  ;;  %v399_v43 = vadd.f32 1.0, %v567_v40 }
 0x226   :  { %v571_v44 = vpop.eup %570  ;;  %580 = vrcp.f32 %v397_v41  ;;  %v398_v45 = vadd.f32 1.0, %v569_v42 }
 0x227   :  { %v573_v46 = vpop.eup %572  ;;  %582 = vrcp.f32 %v399_v43  ;;  %v400_v47 = vadd.f32 1.0, %v571_v44 }
 0x228   :  { %v575_v48 = vpop.eup %574  ;;  %584 = vrcp.f32 %v398_v45  ;;  %v401_v49 = vadd.f32 1.0, %v573_v46 }
 0x229   :  { %v577_v50 = vpop.eup %576  ;;  %586 = vrcp.f32 %v400_v47  ;;  %v403_v51 = vadd.f32 1.0, %v575_v48 }
 0x22a   :  { %v579_v52 = vpop.eup %578  ;;  %588 = vrcp.f32 %v401_v49  ;;  %v402_v53 = vadd.f32 1.0, %v577_v50 }
 0x22b   :  { %590 = vrcp.f32 %v403_v51  ;;  %v404_v54 = vadd.f32 1.0, %v579_v52 }
 0x22c   :  { %592 = vrcp.f32 %v402_v53 }
 0x22d   :  { %594 = vrcp.f32 %v404_v54 }
 0x230   :  { %v581_v55 = vpop.eup %580 }
 0x231   :  { %v583_v56 = vpop.eup %582  ;;  %v421_v57 = vmul.f32 %v581_v55, %v748_v9 }
 0x232   :  { %v585_v58 = vpop.eup %584  ;;  %v423_v59 = vmul.f32 %v583_v56, %v750_v10 }
 0x233   :  { %v587_v60 = vpop.eup %586  ;;  %v422_v61 = vmul.f32 %v585_v58, %v752_v13 }
 0x234   :  { %v589_v62 = vpop.eup %588  ;;  %v424_v63 = vmul.f32 %v587_v60, %v754_v14 }
 0x235   :  { %v591_v0 = vpop.eup %590  ;;  %v507_v1 = vpack.c.bf16 %v422_v61, %v421_v57  ;;  %v425_v2 = vmul.f32 %v589_v62, %v758_v19 }
 0x236   :  { %v593_v3 = vpop.eup %592  ;;  %v508_v4 = vpack.c.bf16 %v424_v63, %v423_v59  ;;  %v427_v5 = vmul.f32 %v591_v0, %v760_v20 }
 0x237   :  { %v595_v6 = vpop.eup %594  ;;  %453 = vst [vmem:[%s797_s5] sm:$0xff] %v507_v1  ;;  %v426_v7 = vmul.f32 %v593_v3, %v764_v25 }
 0x238   :  { %454 = vst [vmem:[%s797_s5 + $0x8] sm:$0xff] %v508_v4  ;;  %v428_v8 = vmul.f32 %v595_v6, %v766_v26 }
 0x239   :  { %v509_v9 = vpack.c.bf16 %v426_v7, %v425_v2 }
 0x23a   :  { %v510_v10 = vpack.c.bf16 %v428_v8, %v427_v5 }
 0x23b   :  { %455 = vst [vmem:[%s797_s5 + $0x10] sm:$0xff] %v509_v9 }
 0x23c   :  { %456 = vst [vmem:[%s797_s5 + $0x18] sm:$0xff] %v510_v10 }

</bundles_post_ra>
